<compile_context>
chip_gen: v7x
topology: tpu7x:2x2x1
jax: 0.10.0
libtpu: 0.0.40
codegen_flags: <defaults>
</compile_context>

<pallas_src>
import functools

import jax
import jax.numpy as jnp
import numpy as np
from jax.experimental import pallas as pl
from jax.experimental.pallas import tpu as pltpu


# ----------------------------------------------------------------------------
# Model dimensions
# ----------------------------------------------------------------------------
C_FEAT = 512        # backbone output channels
RF_HIDDEN = 100     # rf_pool hidden size -> 512 + 100 = 612 = in_feat
IN_FEAT = 612
HIDDEN = 512
NUM_CLASSES = 2

KH = KW = 3
STRIDE = 2
PAD = 1
K_RAW = KH * KW     # 9  (channel repeat folded into the weight)
K_PAD = 16          # zero-padded contraction dim (bf16 sublane-friendly)
TS = 512            # spatial (M) tile of the fused conv+pool kernel


# ----------------------------------------------------------------------------
# Pallas kernels
# ----------------------------------------------------------------------------

def _conv_pool_kernel(patches_ref, w_ref, b_ref, o_ref, acc_ref, *,
                      hw_valid, inv_hw):
    """Fused conv3x3/s2 (as im2col matmul) + bias + ReLU + global avg-pool.

    grid = (B, n_spatial_tiles); the spatial axis is a reduction accumulated
    into a (1, C_FEAT) VMEM scratch, so the feature map never leaves VMEM.
    """
    j = pl.program_id(1)
    ts = patches_ref.shape[1]

    @pl.when(j == 0)
    def _():
        acc_ref[...] = jnp.zeros_like(acc_ref)

    x = patches_ref[0]                                     # (ts, K_PAD) bf16
    conv = jnp.dot(x, w_ref[...], preferred_element_type=jnp.float32)
    conv = jnp.maximum(conv + b_ref[...], 0.0)             # (ts, C_FEAT) f32

    # Mask zero-padded spatial rows (ReLU(bias) would otherwise leak in).
    row = j * ts + jax.lax.broadcasted_iota(jnp.int32, (ts, 1), 0)
    conv = jnp.where(row < hw_valid, conv, 0.0)

    # Sublane-axis reduction -> lane-dense (1, C_FEAT) accumulator.
    acc_ref[...] += jnp.sum(conv, axis=0, keepdims=True)

    @pl.when(j == pl.num_programs(1) - 1)
    def _():
        o_ref[0] = (acc_ref[...] * inv_hw).astype(o_ref.dtype)


def conv_relu_avgpool(patches, w_conv, b_conv, hw_valid):
    """patches (B, HWp, K_PAD) bf16 -> pooled features (B, C_FEAT) f32."""
    B, HWp, K = patches.shape
    n_sp = HWp // TS
    pooled3 = pl.pallas_call(
        functools.partial(_conv_pool_kernel,
                          hw_valid=hw_valid, inv_hw=1.0 / hw_valid),
        out_shape=jax.ShapeDtypeStruct((B, 1, C_FEAT), jnp.float32),
        grid=(B, n_sp),
        in_specs=[
            pl.BlockSpec((1, TS, K), lambda b, j: (b, j, 0)),
            pl.BlockSpec((K, C_FEAT), lambda b, j: (0, 0)),
            pl.BlockSpec((1, C_FEAT), lambda b, j: (0, 0)),
        ],
        out_specs=pl.BlockSpec((1, 1, C_FEAT), lambda b, j: (b, 0, 0)),
        scratch_shapes=[pltpu.VMEM((1, C_FEAT), jnp.float32)],
        compiler_params=pltpu.CompilerParams(
            dimension_semantics=("parallel", "arbitrary"),
            vmem_limit_bytes=32 * 1024 * 1024),
    )(patches, w_conv, b_conv)
    return pooled3.reshape(B, C_FEAT)


def _head_kernel(pooled_ref, rf_w_ref, rf_b_ref, w1r_ref, w1i_ref, b1_ref,
                 w2_ref, b2_ref, o_ref):
    """Fused head: rf_pool linear+ReLU, concat (as split weights), classifier."""
    pooled = pooled_ref[...]                               # (B, 512) f32
    rf = jnp.maximum(
        jnp.dot(pooled, rf_w_ref[...], preferred_element_type=jnp.float32)
        + rf_b_ref[...], 0.0)                              # (B, 100)
    # concat([rf, pooled], 1) @ w1  ==  rf @ w1[:100] + pooled @ w1[100:]
    h = jnp.maximum(
        jnp.dot(rf, w1r_ref[...], preferred_element_type=jnp.float32)
        + jnp.dot(pooled, w1i_ref[...], preferred_element_type=jnp.float32)
        + b1_ref[...], 0.0)                                # (B, 512)
    o_ref[...] = (jnp.dot(h, w2_ref[...], preferred_element_type=jnp.float32)
                  + b2_ref[...]).astype(o_ref.dtype)       # (B, num_classes)


def classifier_head(pooled, params):
    B = pooled.shape[0]
    w1_rf = params["w1"][:RF_HIDDEN]          # (100, 512)
    w1_img = params["w1"][RF_HIDDEN:]         # (512, 512)
    return pl.pallas_call(
        _head_kernel,
        out_shape=jax.ShapeDtypeStruct((B, NUM_CLASSES), jnp.float32),
    )(pooled, params["rf_w"], params["rf_b"].reshape(1, RF_HIDDEN),
      w1_rf, w1_img, params["b1"].reshape(1, HIDDEN),
      params["w2"], params["b2"].reshape(1, NUM_CLASSES))


# ----------------------------------------------------------------------------
# JAX glue: im2col on the single-channel input (channel repeat folded away)
# ----------------------------------------------------------------------------

def _build_patches(images):
    """images (B, 1, H, W) f32 -> patches (B, HWp, K_PAD) bf16, Ho, Wo, HWo.

    Tap order is dh-major / dw-minor (matches the weight fold). Spatial axis
    is zero-padded up to a multiple of TS (masked inside the kernel); K is
    zero-padded 9 -> 16 (zero columns contribute nothing to the dot).
    """
    B, C, H, W = images.shape
    assert C == 1
    x = jnp.pad(images[:, 0], ((0, 0), (PAD, PAD), (PAD, PAD)))
    Ho = (H + 2 * PAD - KH) // STRIDE + 1
    Wo = (W + 2 * PAD - KW) // STRIDE + 1
    taps = []
    for dh in range(KH):
        for dw in range(KW):
            taps.append(
                x[:, dh:dh + STRIDE * Ho:STRIDE, dw:dw + STRIDE * Wo:STRIDE])
    cols = jnp.stack(taps, axis=-1).reshape(B, Ho * Wo, K_RAW)
    HWo = Ho * Wo
    HWp = ((HWo + TS - 1) // TS) * TS
    cols = jnp.pad(cols, ((0, 0), (0, HWp - HWo), (0, K_PAD - K_RAW)))
    return cols.astype(jnp.bfloat16), Ho, Wo, HWo
# TODO(synk): for very large images, build the im2col taps inside the Pallas
# kernel from a VMEM row-band instead of materializing patches in HBM.


# ----------------------------------------------------------------------------
# Model parameters (deterministic, synthetic)
# ----------------------------------------------------------------------------

def init_params(key):
    ks = jax.random.split(key, 8)

    def lin(kw_, kb_, fan_in, fan_out):
        s = 1.0 / np.sqrt(fan_in)
        w = jax.random.uniform(kw_, (fan_in, fan_out), jnp.float32, -s, s)
        b = jax.random.uniform(kb_, (fan_out,), jnp.float32, -s, s)
        return w, b

    # conv weight in PyTorch OIHW with 3 input channels. Since the model feeds
    # a 1->3 channel repeat, summing over the input-channel axis is exact.
    fan_in_conv = 3 * KH * KW
    s = 1.0 / np.sqrt(fan_in_conv)
    conv_w_oihw = jax.random.uniform(ks[0], (C_FEAT, 3, KH, KW),
                                     jnp.float32, -s, s)
    conv_w = conv_w_oihw.sum(axis=1).reshape(C_FEAT, K_RAW).T   # (9, 512)
    conv_w = jnp.pad(conv_w, ((0, K_PAD - K_RAW), (0, 0)))      # (16, 512)
    conv_b = jax.random.uniform(ks[1], (C_FEAT,), jnp.float32, -s, s)

    rf_w, rf_b = lin(ks[2], ks[3], C_FEAT, RF_HIDDEN)            # rf_pool proj
    w1, b1 = lin(ks[4], ks[5], IN_FEAT, HIDDEN)                  # classifier[1]
    w2, b2 = lin(ks[6], ks[7], HIDDEN, NUM_CLASSES)              # classifier[4]
    return dict(conv_w=conv_w, conv_b=conv_b, rf_w=rf_w, rf_b=rf_b,
                w1=w1, b1=b1, w2=w2, b2=b2)


# ----------------------------------------------------------------------------
# Forward pass (mirrors FineTuneMIRAI.forward, inference semantics)
# ----------------------------------------------------------------------------

def finetune_mirai_forward(params, images):
    assert images.ndim == 4, f"Input must be 4D tensor, got {images.shape}"
    assert images.shape[1] == 1, \
        f"Expected single channel input, got {images.shape[1]}"

    # images.repeat(1, 3, 1, 1) is folded into the conv weight (exact).
    patches, Ho, Wo, HWo = _build_patches(images)          # (B, HWp, 16) bf16

    # image_encoder conv3x3/s2 + ReLU fused with AdaptiveAvgPool2d(1).
    pooled = conv_relu_avgpool(
        patches,
        params["conv_w"].astype(jnp.bfloat16),             # bf16 MXU operands
        params["conv_b"].reshape(1, C_FEAT),
        HWo)                                               # (B, 512) f32

    # TODO(synk): real MIRAI RiskFactorPool internals unavailable; synthetic
    # rf_pool = ReLU(Linear(pooled, 100)) giving rf_hidden (B, 100), fused
    # with concat + classifier (Dropout layers are identity in eval).
    predict = classifier_head(pooled, params)              # (B, num_classes)
    return {"predict": predict}


# Pure-jnp reference for correctness checking of the Pallas path.
def _reference_forward(params, images):
    patches, Ho, Wo, HWo = _build_patches(images)
    HWp = patches.shape[1]
    w_bf = params["conv_w"].astype(jnp.bfloat16)
    conv = jnp.dot(patches, w_bf, preferred_element_type=jnp.float32)
    conv = jnp.maximum(conv + params["conv_b"][None, None, :], 0.0)
    conv = jnp.where((jnp.arange(HWp) < HWo)[None, :, None], conv, 0.0)
    pooled = jnp.sum(conv, axis=1) / HWo                   # (B, 512)
    rf = jnp.maximum(pooled @ params["rf_w"] + params["rf_b"], 0.0)
    cat = jnp.concatenate([rf, pooled], axis=1)            # (B, 612)
    h = jnp.maximum(cat @ params["w1"] + params["b1"], 0.0)
    return h @ params["w2"] + params["b2"]


if __name__ == "__main__":
    key = jax.random.PRNGKey(0)
    pkey, xkey = jax.random.split(key)
    params = init_params(pkey)

    B, H, W = 2, 32, 32
    images = jax.random.normal(xkey, (B, 1, H, W), dtype=jnp.float32)

    out = finetune_mirai_forward(params, images)
    predict = jax.block_until_ready(out["predict"])
    assert predict.shape == (B, NUM_CLASSES), predict.shape
    assert bool(jnp.all(jnp.isfinite(predict)))

    ref = _reference_forward(params, images)
    np.testing.assert_allclose(np.asarray(predict), np.asarray(ref),
                               rtol=1e-3, atol=1e-3)
    print("KERNEL_OK")
</pallas_src>

<mosaic_0001>
module attributes {stable_mosaic.version = 11 : i64} {
  func.func @_conv_pool_kernel(%arg0: i32, %arg1: i32, %arg2: memref<1x512x16xbf16, #tpu.memory_space<vmem>>, %arg3: memref<16x512xbf16, #tpu.memory_space<vmem>>, %arg4: memref<1x512xf32, #tpu.memory_space<vmem>>, %arg5: memref<1x1x512xf32, #tpu.memory_space<vmem>>, %arg6: memref<1x512xf32, #tpu.memory_space<vmem>>) attributes {dimension_semantics = [#tpu.dimension_semantics<parallel>, #tpu.dimension_semantics<arbitrary>], iteration_bounds = array<i64: 2, 1>, scalar_prefetch = 0 : i64, scratch_operands = 1 : i64, tpu.core_type = #tpu.core_type<tc>, window_params = [{transform_indices = @transform_0, window_bounds = array<i64: 1, 512, 16>}, {pipeline_mode = #tpu.pipeline_mode<synchronous>, transform_indices = @transform_1, window_bounds = array<i64: 16, 512>}, {pipeline_mode = #tpu.pipeline_mode<synchronous>, transform_indices = @transform_2, window_bounds = array<i64: 1, 512>}, {transform_indices = @transform_3, window_bounds = array<i64: 1, 1, 512>}]} {
    %c0_i32 = arith.constant 0 : i32
    %0 = arith.cmpi eq, %arg1, %c0_i32 : i32
    %1 = arith.extui %0 : i1 to i32
    %c0_i32_0 = arith.constant 0 : i32
    %2 = arith.cmpi ne, %1, %c0_i32_0 : i32
    scf.if %2 {
      %cst_16 = arith.constant 0.000000e+00 : f32
      %30 = vector.broadcast %cst_16 : f32 to vector<1x512xf32>
      %c0_17 = arith.constant 0 : index
      %c0_18 = arith.constant 0 : index
      %31 = vector.load %arg6[%c0_17, %c0_18] : memref<1x512xf32, #tpu.memory_space<vmem>>, vector<1x512xf32>
      tpu.vector_store %arg6[%c0_17, %c0_18], %30 {strides = array<i32>} : memref<1x512xf32, #tpu.memory_space<vmem>>, vector<1x512xf32>,
    } else {
    }
    %c0 = arith.constant 0 : index
    %c0_1 = arith.constant 0 : index
    %c0_2 = arith.constant 0 : index
    %3 = vector.load %arg2[%c0, %c0_1, %c0_2] : memref<1x512x16xbf16, #tpu.memory_space<vmem>>, vector<1x512x16xbf16>
    %4 = vector.shape_cast %3 : vector<1x512x16xbf16> to vector<512x16xbf16>
    %c0_3 = arith.constant 0 : index
    %c0_4 = arith.constant 0 : index
    %5 = vector.load %arg3[%c0_3, %c0_4] : memref<16x512xbf16, #tpu.memory_space<vmem>>, vector<16x512xbf16>
    %cst = arith.constant dense<0.000000e+00> : vector<512x512xf32>
    %6 = tpu.matmul %4, %5, %cst {dimension_numbers = #tpu.dot_dimension_numbers<[1], [0], [0], [1], [0, 0, 1, 1], [], []>} : vector<512x16xbf16>, vector<16x512xbf16>, vector<512x512xf32> -> vector<512x512xf32>
    %c0_5 = arith.constant 0 : index
    %c0_6 = arith.constant 0 : index
    %7 = vector.load %arg4[%c0_5, %c0_6] : memref<1x512xf32, #tpu.memory_space<vmem>>, vector<1x512xf32>
    %8 = vector.broadcast %7 : vector<1x512xf32> to vector<512x512xf32>
    %9 = arith.addf %6, %8 : vector<512x512xf32>
    %cst_7 = arith.constant 0.000000e+00 : f32
    %10 = vector.broadcast %cst_7 : f32 to vector<512x512xf32>
    %11 = arith.maximumf %9, %10 : vector<512x512xf32>
    %c512_i32 = arith.constant 512 : i32
    %12 = arith.muli %arg1, %c512_i32 : i32
    %13 = tpu.iota {dimensions = array<i32: 0>} : vector<512x1xi32>
    %14 = vector.broadcast %12 : i32 to vector<512x1xi32>
    %15 = arith.addi %14, %13 : vector<512x1xi32>
    %c256_i32 = arith.constant 256 : i32
    %16 = vector.broadcast %c256_i32 : i32 to vector<512x1xi32>
    %17 = arith.cmpi slt, %15, %16 : vector<512x1xi32>
    %cst_8 = arith.constant 0.000000e+00 : f32
    %18 = vector.shape_cast %17 : vector<512x1xi1> to vector<512x1xi1>
    %19 = vector.broadcast %18 : vector<512x1xi1> to vector<512x512xi1>
    %20 = vector.broadcast %cst_8 : f32 to vector<512x512xf32>
    %21 = arith.select %19, %11, %20 : vector<512x512xi1>, vector<512x512xf32>
    %c0_9 = arith.constant 0 : index
    %c0_10 = arith.constant 0 : index
    %22 = vector.load %arg6[%c0_9, %c0_10] : memref<1x512xf32, #tpu.memory_space<vmem>>, vector<1x512xf32>
    %cst_11 = arith.constant dense<0.000000e+00> : vector<512xf32>
    %23 = vector.multi_reduction <add>, %21, %cst_11 [0] : vector<512x512xf32> to vector<512xf32>
    %24 = vector.shape_cast %23 : vector<512xf32> to vector<1x512xf32>
    %25 = arith.addf %22, %24 : vector<1x512xf32>
    %c0_12 = arith.constant 0 : index
    %c0_13 = arith.constant 0 : index
    %26 = vector.load %arg6[%c0_12, %c0_13] : memref<1x512xf32, #tpu.memory_space<vmem>>, vector<1x512xf32>
    tpu.vector_store %arg6[%c0_12, %c0_13], %25 {strides = array<i32>} : memref<1x512xf32, #tpu.memory_space<vmem>>, vector<1x512xf32>,
    %c0_i32_14 = arith.constant 0 : i32
    %27 = arith.cmpi eq, %arg1, %c0_i32_14 : i32
    %28 = arith.extui %27 : i1 to i32
    %c0_i32_15 = arith.constant 0 : i32
    %29 = arith.cmpi ne, %28, %c0_i32_15 : i32
    scf.if %29 {
      %c0_16 = arith.constant 0 : index
      %c0_17 = arith.constant 0 : index
      %30 = vector.load %arg6[%c0_16, %c0_17] : memref<1x512xf32, #tpu.memory_space<vmem>>, vector<1x512xf32>
      %cst_18 = arith.constant 3.906250e-03 : f32
      %31 = vector.broadcast %cst_18 : f32 to vector<1x512xf32>
      %32 = arith.mulf %30, %31 : vector<1x512xf32>
      %c0_19 = arith.constant 0 : index
      %c0_20 = arith.constant 0 : index
      %c0_21 = arith.constant 0 : index
      %33 = vector.load %arg5[%c0_19, %c0_20, %c0_21] : memref<1x1x512xf32, #tpu.memory_space<vmem>>, vector<1x1x512xf32>
      %34 = vector.shape_cast %33 : vector<1x1x512xf32> to vector<1x512xf32>
      %35 = vector.shape_cast %32 : vector<1x512xf32> to vector<1x1x512xf32>
      tpu.vector_store %arg5[%c0_19, %c0_20, %c0_21], %35 {strides = array<i32>} : memref<1x1x512xf32, #tpu.memory_space<vmem>>, vector<1x1x512xf32>,
    } else {
    }
    return
  }
  func.func @transform_0(%arg0: i32, %arg1: i32) -> (i32, i32, i32) {
    %c0_i32 = arith.constant 0 : i32
    %c0_i32_0 = arith.constant 0 : i32
    return %arg0, %arg1, %c0_i32 : i32, i32, i32
  }
  func.func @transform_1(%arg0: i32, %arg1: i32) -> (i32, i32) {
    %c0_i32 = arith.constant 0 : i32
    %c0_i32_0 = arith.constant 0 : i32
    %c0_i32_1 = arith.constant 0 : i32
    return %c0_i32, %c0_i32_0 : i32, i32
  }
  func.func @transform_2(%arg0: i32, %arg1: i32) -> (i32, i32) {
    %c0_i32 = arith.constant 0 : i32
    %c0_i32_0 = arith.constant 0 : i32
    %c0_i32_1 = arith.constant 0 : i32
    return %c0_i32, %c0_i32_0 : i32, i32
  }
  func.func @transform_3(%arg0: i32, %arg1: i32) -> (i32, i32, i32) {
    %c0_i32 = arith.constant 0 : i32
    %c0_i32_0 = arith.constant 0 : i32
    %c0_i32_1 = arith.constant 0 : i32
    return %arg0, %c0_i32, %c0_i32_0 : i32, i32, i32
  }
}

</mosaic_0001>

<bundles_post_ra>
// kernel: tpu_custom_call.1
= control target key start
LH: loop header
LB: loop body
LE: loop exit
PB: predicated region body
PF: predicated region fallthrough
CT: control target
= control target key end

     0   :  { %8 = vsyncpa [#allocation4], 0  ;;  %s3280_s0 = inlined_call_operand.vmem [shape: bf16[2,512,16], index: 0, kind: input, shape index: {}]   ;;  %s3281_s1 = inlined_call_operand.vmem [shape: bf16[16,512], index: 1, kind: input, shape index: {}]   ;;  %s3282_s2 = inlined_call_operand.vmem [shape: f32[1,512], index: 2, kind: input, shape index: {}]   ;;  %s3283_s3 = inlined_call_operand.hbm [shape: f32[2,1,512], index: 3, kind: output, shape index: {}]  }
   0x1   :  { %10 = vsyncpa [#allocation4 + $0x1], 0  ;;  %s2836_s12 = smov 0   ;;  %s2838_s13 = smov 0  }
   0x2   :  { %s2840_s14 = smov 0   ;;  %s2842_s15 = smov 0  }
   0x3   :  { %s2844_s16 = smov 0   ;;  %s2846_s17 = smov 0  }
   0x4 LB: > { %s2521_s18 = sadd.s32 4294967295, %s2810_s17   ;;  %s2522_s19 = sadd.s32 4294967294, %s2810_s17   ;;  %s2810_s17 = sphi %s2846_s17, %s16_s17   ;;  %s2806_s16 = sphi %s2844_s16, %s3292_s16   ;;  %s2802_s15 = sphi %s2842_s15, %s3291_s15   ;;  %s2798_s14 = sphi %s2840_s14, %s3290_s14   ;;  %s2794_s13 = sphi %s2838_s13, %s3289_s13   ;;  %s2790_s12 = sphi %s2836_s12, %s3288_s12  }
   0x5   : > { %s28_s20 = sadd.s32 1, %s2806_s16  ;;  %s105_s21 = sadd.s32 1, %s2798_s14 }
   0x6   : > { %p30_p0 = scmp.ge.s32.totalorder %s28_s20, 2  ;;  %p115_p1 = scmp.ne.s32.totalorder %s2798_s14, %s2794_s13 }
   0x7   : > { %p116_p2 = scmp.eq.s32.totalorder %s2521_s18, 1  ;;  %p121_p3 = scmp.ne.s32.totalorder %s2794_s13, %s2790_s12 }
   0x8   : > { %s3294_s20 = smov (%p30_p0, %s28_s20), 0  ;;  %p122_p5 = scmp.eq.s32.totalorder %s2522_s19, 1 }
   0x9   : > { %p2876_p4 = por %p116_p2, %p115_p1  ;;  %s102_s23 = ssub.s32 %s2806_s16, %s3294_s20 }
   0xa   : > { %p2525_p6 = scmp.ge.s32.totalorder %s2810_s17, 1  ;;  %p103_p7 = scmp.eq.s32.totalorder %s102_s23, 0 }
   0xb   : > { %p2883_p8 = por %p122_p5, %p121_p3  ;;  %p159_p9 = scmp.lt.s32.totalorder %s2810_s17, 3 }
   0xc   : > { %s2889_s25 = scalar_select %p103_p7, %s2798_s14, %s105_s21  }
   0xd   : > { %p160_p10 = pnand %p2525_p6, %p159_p9 }
   0xe   : > { %v2694_v0 = vld [vmem:[%s3281_s1 + $0x4] ss:$16 sps:$4 sm:$0xff] (!%p160_p10)   ;;  %p188_p11 = scmp.lt.s32.totalorder (!%p160_p10), %s2802_s15, 1  ;;  %v2696_v1 = vld [vmem:[%s3281_s1 + $0xc] ss:$16 sps:$4 sm:$0xff] (!%p160_p10)   ;;  %v2812_v2 = vmov (!%p160_p10), 0   ;;  %v202_v31 = vlaneseq (!%p160_p10) }
   0xf   : > { %163 = sbr.rel (%p160_p10) target bundleno = 490 (0x1ea), region = 32  ;;  %606 = vmatprep.mubr.bf16.mxu0 (!%p160_p10), %v2812_v2  ;;  %959 = vmatprep.mubr.bf16.mxu1 (!%p160_p10), %v2812_v2  ;;  %v2698_v3 = vld [vmem:[%s3281_s1] ss:$16 sps:$4 sm:$0xff] (!%p160_p10)   ;;  %v2699_v4 = vld [vmem:[%s3281_s1 + $0x8] ss:$16 sps:$4 sm:$0xff] (!%p160_p10)   ;;  %vm477_vm0 = vcmask (!%p160_p10), 130048  }
  0x10   : > { %574 = vmatprep.subr.bf16.mxu0 (!%p160_p10), %v2694_v0  ;;  %927 = vmatprep.subr.bf16.mxu1 (!%p160_p10), %v2696_v1  ;;  %v3041_v32 = vshrl.u32 (!%p160_p10), %v202_v31, 7  ;;  %v275_v36 = vld [vmem:[%s3282_s2] sm:$0xf] (!%p160_p10)  ;;  %vm3092_vm1 = vcmp.lt.s32.totalorder (!%p160_p10), %v202_v31, 512  ;;  %s184_s21 = sand.u32 (!%p160_p10), 1, %s2794_s13   ;;  %s2635_s26 = sshll.u32 (!%p160_p10), %s2802_s15, 6 }
  0x11   : > { %575 = vmatpush1.bf16.msra.mxu0 (!%p160_p10), %v2698_v3  ;;  %928 = vmatpush1.bf16.msra.mxu1 (!%p160_p10), %v2699_v4  ;;  %s2526_s23 = sshll.u32 (!%p160_p10), %s184_s21, 2  ;;  %s3231_s4 = scalar_lea.hbm (!%p160_p10), %s3283_s3, %s2635_s26 }
  0x12   : > { %v279_v34 = vsub.s32 (!%p160_p10), 0, %v3041_v32  ;;  %v287_v35 = vsub.s32 (!%p160_p10), 2, %v3041_v32  ;;  %v283_v37 = vsub.s32 (!%p160_p10), 1, %v3041_v32  ;;  %v291_v38 = vsub.s32 (!%p160_p10), 3, %v3041_v32  ;;  %s186_s27 = scalar_lea.vmem (!%p160_p10), [#allocation3], %s2526_s23  ;;  %s2815_s6 = smov (!%p160_p10), [#allocation3]  }
  0x13   : > { %s2448_s28 = sshll.u32 (!%p160_p10), %s186_s27, 4  ;;  %s3233_s28 = int_to_ptr.vmem [resolvable:$true] %s2448_s28 }
  0x14   : > { %v3055_v39 = vrot.slane (!%p160_p10), %v275_v36, %v279_v34  ;;  %v3057_v40 = vrot.slane (!%p160_p10), %v275_v36, %v287_v35  ;;  %v3059_v41 = vrot.slane (!%p160_p10), %v275_v36, %v283_v37  ;;  %v3061_v42 = vrot.slane (!%p160_p10), %v275_v36, %v291_v38  ;;  %s2732_s5 = scalar_lea.vmem (!%p160_p10), %s3233_s28, 64 }
  0x15   : > { %p2733_p12 = scmp.ne.s32.totalorder (!%p160_p10), %s3233_s28, %s2732_s5 }
  0x16   : > { %s189_s7 = scalar_select %p188_p11, %s2802_s15, 1 }
  0x17   : > { %s2434_s15 = scalar_lea.sflag [#allocation4], %s184_s21  ;;  %p2734_p13 = pnand %p2733_p12, %p2876_p4 }
  0x18   : > { %s2634_s8 = sshll.u32 %s189_s7, 8  ;;  %s2736_s7 = sshll.u32 %s2815_s6, 4  ;;  %s2737_s7 = int_to_ptr.vmem [resolvable:$false] %s2736_s7 }
  0x19   : > { %s2910_s11 = scalar_lea.vmem %s3280_s0, %s2634_s8  ;;  %p2735_p0 = pneg %p2734_p13 }
  0x1a   : > { %v2700_v5 = vld [vmem:[%s2910_s11] sm:$0xff]   ;;  %v2701_v6 = vld [vmem:[%s2910_s11 + $0x8] sm:$0xff]   ;;  %v2702_v7 = vld [vmem:[%s2910_s11 + $0x10] sm:$0xff]   ;;  %s2738_s8 = scalar_lea.vmem %s2737_s7, 128  ;;  %p2739_p1 = scmp.lt.s32.totalorder %s3233_s28, %s2737_s7 }
  0x1b   : > { %2565 = vmatmul.mubr.msk.bf16.vlgmr.msra.gmra.mrb[0].mxu0 %vm477_vm0, %v2700_v5  ;;  %2597 = vmatmul.mubr.msk.bf16.vlgmr.msra.gmra.mrb[0].mxu1 %vm477_vm0, %v2700_v5  ;;  %v2703_v8 = vld [vmem:[%s2910_s11 + $0x18] sm:$0xff]   ;;  %v2704_v9 = vld [vmem:[%s2910_s11 + $0x20] sm:$0xff]   ;;  %v2705_v10 = vld [vmem:[%s2910_s11 + $0x28] sm:$0xff]   ;;  %p2740_p2 = scmp.lt.s32.totalorder %s2738_s8, %s2732_s5 }
  0x1c   : > { %616 = vmatprep.mubr.bf16.mxu0 %v2812_v2  ;;  %969 = vmatprep.mubr.bf16.mxu1 %v2812_v2  ;;  %v2706_v11 = vld [vmem:[%s2910_s11 + $0x30] sm:$0xff]   ;;  %v2707_v12 = vld [vmem:[%s2910_s11 + $0x38] sm:$0xff]   ;;  %v2708_v13 = vld [vmem:[%s2910_s11 + $0x40] sm:$0xff]  }
  0x1d   : > { %v2709_v14 = vld [vmem:[%s2910_s11 + $0x48] sm:$0xff]   ;;  %v2710_v15 = vld [vmem:[%s2910_s11 + $0x50] sm:$0xff]   ;;  %v2711_v16 = vld [vmem:[%s2910_s11 + $0x58] sm:$0xff]   ;;  %p2741_p3 = por %p2740_p2, %p2739_p1 }
  0x1e   : > { %v2712_v17 = vld [vmem:[%s2910_s11 + $0x60] sm:$0xff]   ;;  %v2713_v18 = vld [vmem:[%s2910_s11 + $0x68] sm:$0xff]   ;;  %v2714_v19 = vld [vmem:[%s2910_s11 + $0x70] sm:$0xff]  }
  0x1f   : > { %v2715_v20 = vld [vmem:[%s2910_s11 + $0x78] sm:$0xff]   ;;  %v2716_v21 = vld [vmem:[%s2910_s11 + $0x80] sm:$0xff]   ;;  %v2717_v22 = vld [vmem:[%s2910_s11 + $0x88] sm:$0xff]   ;;  %p2742_p5 = pnand %p2741_p3, %p2735_p0 }
  0x20   : > { %v2718_v23 = vld [vmem:[%s2910_s11 + $0x90] sm:$0xff]   ;;  %v2719_v24 = vld [vmem:[%s2910_s11 + $0x98] sm:$0xff]   ;;  %v2720_v25 = vld [vmem:[%s2910_s11 + $0xa0] sm:$0xff]  }
  0x21   : > { %v2721_v26 = vld [vmem:[%s2910_s11 + $0xa8] sm:$0xff]   ;;  %v2722_v27 = vld [vmem:[%s2910_s11 + $0xb0] sm:$0xff]   ;;  %v2723_v28 = vld [vmem:[%s2910_s11 + $0xb8] sm:$0xff]  }
  0x22   : > { %v2724_v29 = vld [vmem:[%s2910_s11 + $0xc0] sm:$0xff]   ;;  %v2725_v30 = vld [vmem:[%s2910_s11 + $0xc8] sm:$0xff]   ;;  %v2726_v33 = vld [vmem:[%s2910_s11 + $0xd0] sm:$0xff]  }
  0x23   : > { %2566 = vmatmul.mubr.msk.bf16.gmra.mrb[4].mxu0 %vm477_vm0, %v2701_v6  ;;  %2598 = vmatmul.mubr.msk.bf16.gmra.mrb[4].mxu1 %vm477_vm0, %v2701_v6  ;;  %v2727_v49 = vld [vmem:[%s2910_s11 + $0xd8] sm:$0xff]  }
  0x24   : > { %626 = vmatprep.mubr.bf16.mxu0 %v2812_v2  ;;  %979 = vmatprep.mubr.bf16.mxu1 %v2812_v2 }
  0x2b   : > { %2567 = vmatmul.mubr.msk.bf16.gmra.mrb[8].mxu0 %vm477_vm0, %v2702_v7  ;;  %2599 = vmatmul.mubr.msk.bf16.gmra.mrb[8].mxu1 %vm477_vm0, %v2702_v7 }
  0x2c   : > { %636 = vmatprep.mubr.bf16.mxu0 %v2812_v2  ;;  %989 = vmatprep.mubr.bf16.mxu1 %v2812_v2 }
  0x33   : > { %2568 = vmatmul.mubr.msk.bf16.gmra.mrb[12].mxu0 %vm477_vm0, %v2703_v8  ;;  %2600 = vmatmul.mubr.msk.bf16.gmra.mrb[12].mxu1 %vm477_vm0, %v2703_v8 }
  0x34   : > { %646 = vmatprep.mubr.bf16.mxu0 %v2812_v2  ;;  %999 = vmatprep.mubr.bf16.mxu1 %v2812_v2 }
  0x3b   : > { %2569 = vmatmul.mubr.msk.bf16.gmra.mrb[16].mxu0 %vm477_vm0, %v2704_v9  ;;  %2601 = vmatmul.mubr.msk.bf16.gmra.mrb[16].mxu1 %vm477_vm0, %v2704_v9 }
  0x3c   : > { %656 = vmatprep.mubr.bf16.mxu0 %v2812_v2  ;;  %1009 = vmatprep.mubr.bf16.mxu1 %v2812_v2 }
  0x43   : > { %2570 = vmatmul.mubr.msk.bf16.gmra.mrb[20].mxu0 %vm477_vm0, %v2705_v10  ;;  %2602 = vmatmul.mubr.msk.bf16.gmra.mrb[20].mxu1 %vm477_vm0, %v2705_v10 }
  0x44   : > { %666 = vmatprep.mubr.bf16.mxu0 %v2812_v2  ;;  %1019 = vmatprep.mubr.bf16.mxu1 %v2812_v2 }
  0x4b   : > { %2571 = vmatmul.mubr.msk.bf16.gmra.mrb[24].mxu0 %vm477_vm0, %v2706_v11  ;;  %2603 = vmatmul.mubr.msk.bf16.gmra.mrb[24].mxu1 %vm477_vm0, %v2706_v11 }
  0x4c   : > { %676 = vmatprep.mubr.bf16.mxu0 %v2812_v2  ;;  %1029 = vmatprep.mubr.bf16.mxu1 %v2812_v2 }
  0x53   : > { %2572 = vmatmul.mubr.msk.bf16.gmra.mrb[28].mxu0 %vm477_vm0, %v2707_v12  ;;  %2604 = vmatmul.mubr.msk.bf16.gmra.mrb[28].mxu1 %vm477_vm0, %v2707_v12 }
  0x54   : > { %686 = vmatprep.mubr.bf16.mxu0 %v2812_v2  ;;  %1039 = vmatprep.mubr.bf16.mxu1 %v2812_v2 }
  0x5b   : > { %2573 = vmatmul.mubr.msk.bf16.gmra.mrb[32].mxu0 %vm477_vm0, %v2708_v13  ;;  %2605 = vmatmul.mubr.msk.bf16.gmra.mrb[32].mxu1 %vm477_vm0, %v2708_v13 }
  0x5c   : > { %696 = vmatprep.mubr.bf16.mxu0 %v2812_v2  ;;  %1049 = vmatprep.mubr.bf16.mxu1 %v2812_v2 }
  0x63   : > { %2574 = vmatmul.mubr.msk.bf16.gmra.mrb[36].mxu0 %vm477_vm0, %v2709_v14  ;;  %2606 = vmatmul.mubr.msk.bf16.gmra.mrb[36].mxu1 %vm477_vm0, %v2709_v14 }
  0x64   : > { %706 = vmatprep.mubr.bf16.mxu0 %v2812_v2  ;;  %1059 = vmatprep.mubr.bf16.mxu1 %v2812_v2 }
  0x6b   : > { %2575 = vmatmul.mubr.msk.bf16.gmra.mrb[40].mxu0 %vm477_vm0, %v2710_v15  ;;  %2607 = vmatmul.mubr.msk.bf16.gmra.mrb[40].mxu1 %vm477_vm0, %v2710_v15  ;;  %v2728_v15 = vld [vmem:[%s2910_s11 + $0xe0] sm:$0xff]  }
  0x6c   : > { %716 = vmatprep.mubr.bf16.mxu0 %v2812_v2  ;;  %1069 = vmatprep.mubr.bf16.mxu1 %v2812_v2 }
  0x73   : > { %2576 = vmatmul.mubr.msk.bf16.gmra.mrb[44].mxu0 %vm477_vm0, %v2711_v16  ;;  %2608 = vmatmul.mubr.msk.bf16.gmra.mrb[44].mxu1 %vm477_vm0, %v2711_v16 }
  0x74   : > { %726 = vmatprep.mubr.bf16.mxu0 %v2812_v2  ;;  %1079 = vmatprep.mubr.bf16.mxu1 %v2812_v2 }
  0x7b   : > { %2577 = vmatmul.mubr.msk.bf16.gmra.mrb[48].mxu0 %vm477_vm0, %v2712_v17  ;;  %2609 = vmatmul.mubr.msk.bf16.gmra.mrb[48].mxu1 %vm477_vm0, %v2712_v17 }
  0x7c   : > { %736 = vmatprep.mubr.bf16.mxu0 %v2812_v2  ;;  %1089 = vmatprep.mubr.bf16.mxu1 %v2812_v2 }
  0x83   : > { %2578 = vmatmul.mubr.msk.bf16.gmra.mrb[52].mxu0 %vm477_vm0, %v2713_v18  ;;  %2610 = vmatmul.mubr.msk.bf16.gmra.mrb[52].mxu1 %vm477_vm0, %v2713_v18 }
  0x84   : > { %746 = vmatprep.mubr.bf16.mxu0 %v2812_v2  ;;  %1099 = vmatprep.mubr.bf16.mxu1 %v2812_v2 }
  0x8b   : > { %2579 = vmatmul.mubr.msk.bf16.gmra.mrb[56].mxu0 %vm477_vm0, %v2714_v19  ;;  %2611 = vmatmul.mubr.msk.bf16.gmra.mrb[56].mxu1 %vm477_vm0, %v2714_v19 }
  0x8c   : > { %756 = vmatprep.mubr.bf16.mxu0 %v2812_v2  ;;  %1109 = vmatprep.mubr.bf16.mxu1 %v2812_v2 }
  0x93   : > { %2580 = vmatmul.mubr.msk.bf16.gmra.mrb[60].mxu0 %vm477_vm0, %v2715_v20  ;;  %2612 = vmatmul.mubr.msk.bf16.gmra.mrb[60].mxu1 %vm477_vm0, %v2715_v20 }
  0x94   : > { %766 = vmatprep.mubr.bf16.mxu0 %v2812_v2  ;;  %1119 = vmatprep.mubr.bf16.mxu1 %v2812_v2 }
  0x9b   : > { %2581 = vmatmul.mubr.msk.bf16.gmra.mrb[64].mxu0 %vm477_vm0, %v2716_v21  ;;  %2613 = vmatmul.mubr.msk.bf16.gmra.mrb[64].mxu1 %vm477_vm0, %v2716_v21 }
  0x9c   : > { %776 = vmatprep.mubr.bf16.mxu0 %v2812_v2  ;;  %1129 = vmatprep.mubr.bf16.mxu1 %v2812_v2 }
  0xa3   : > { %2582 = vmatmul.mubr.msk.bf16.gmra.mrb[68].mxu0 %vm477_vm0, %v2717_v22  ;;  %2614 = vmatmul.mubr.msk.bf16.gmra.mrb[68].mxu1 %vm477_vm0, %v2717_v22 }
  0xa4   : > { %786 = vmatprep.mubr.bf16.mxu0 %v2812_v2  ;;  %1139 = vmatprep.mubr.bf16.mxu1 %v2812_v2 }
  0xab   : > { %2583 = vmatmul.mubr.msk.bf16.gmra.mrb[72].mxu0 %vm477_vm0, %v2718_v23  ;;  %2615 = vmatmul.mubr.msk.bf16.gmra.mrb[72].mxu1 %vm477_vm0, %v2718_v23 }
  0xac   : > { %796 = vmatprep.mubr.bf16.mxu0 %v2812_v2  ;;  %1149 = vmatprep.mubr.bf16.mxu1 %v2812_v2 }
  0xb3   : > { %2584 = vmatmul.mubr.msk.bf16.gmra.mrb[76].mxu0 %vm477_vm0, %v2719_v24  ;;  %2616 = vmatmul.mubr.msk.bf16.gmra.mrb[76].mxu1 %vm477_vm0, %v2719_v24 }
  0xb4   : > { %806 = vmatprep.mubr.bf16.mxu0 %v2812_v2  ;;  %1159 = vmatprep.mubr.bf16.mxu1 %v2812_v2 }
  0xbb   : > { %2585 = vmatmul.mubr.msk.bf16.gmra.mrb[80].mxu0 %vm477_vm0, %v2720_v25  ;;  %2617 = vmatmul.mubr.msk.bf16.gmra.mrb[80].mxu1 %vm477_vm0, %v2720_v25 }
  0xbc   : > { %816 = vmatprep.mubr.bf16.mxu0 %v2812_v2  ;;  %1169 = vmatprep.mubr.bf16.mxu1 %v2812_v2 }
  0xc3   : > { %2586 = vmatmul.mubr.msk.bf16.gmra.mrb[84].mxu0 %vm477_vm0, %v2721_v26  ;;  %2618 = vmatmul.mubr.msk.bf16.gmra.mrb[84].mxu1 %vm477_vm0, %v2721_v26 }
  0xc4   : > { %826 = vmatprep.mubr.bf16.mxu0 %v2812_v2  ;;  %1179 = vmatprep.mubr.bf16.mxu1 %v2812_v2 }
  0xcb   : > { %2587 = vmatmul.mubr.msk.bf16.gmra.mrb[88].mxu0 %vm477_vm0, %v2722_v27  ;;  %2619 = vmatmul.mubr.msk.bf16.gmra.mrb[88].mxu1 %vm477_vm0, %v2722_v27 }
  0xcc   : > { %836 = vmatprep.mubr.bf16.mxu0 %v2812_v2  ;;  %1189 = vmatprep.mubr.bf16.mxu1 %v2812_v2 }
  0xd3   : > { %2588 = vmatmul.mubr.msk.bf16.gmra.mrb[92].mxu0 %vm477_vm0, %v2723_v28  ;;  %2620 = vmatmul.mubr.msk.bf16.gmra.mrb[92].mxu1 %vm477_vm0, %v2723_v28 }
  0xd4   : > { %846 = vmatprep.mubr.bf16.mxu0 %v2812_v2  ;;  %1199 = vmatprep.mubr.bf16.mxu1 %v2812_v2 }
  0xdb   : > { %2589 = vmatmul.mubr.msk.bf16.gmra.mrb[96].mxu0 %vm477_vm0, %v2724_v29  ;;  %2621 = vmatmul.mubr.msk.bf16.gmra.mrb[96].mxu1 %vm477_vm0, %v2724_v29 }
  0xdc   : > { %856 = vmatprep.mubr.bf16.mxu0 %v2812_v2  ;;  %1209 = vmatprep.mubr.bf16.mxu1 %v2812_v2 }
  0xe3   : > { %2590 = vmatmul.mubr.msk.bf16.gmra.mrb[100].mxu0 %vm477_vm0, %v2725_v30  ;;  %2622 = vmatmul.mubr.msk.bf16.gmra.mrb[100].mxu1 %vm477_vm0, %v2725_v30 }
  0xe4   : > { %866 = vmatprep.mubr.bf16.mxu0 %v2812_v2  ;;  %1219 = vmatprep.mubr.bf16.mxu1 %v2812_v2 }
  0xeb   : > { %2591 = vmatmul.mubr.msk.bf16.gmra.mrb[104].mxu0 %vm477_vm0, %v2726_v33  ;;  %2623 = vmatmul.mubr.msk.bf16.gmra.mrb[104].mxu1 %vm477_vm0, %v2726_v33 }
  0xec   : > { %876 = vmatprep.mubr.bf16.mxu0 %v2812_v2  ;;  %1229 = vmatprep.mubr.bf16.mxu1 %v2812_v2 }
  0xee   : > { %v608_v43 = vpop.f32.mrb[0].mxu0  ;;  %v961_v44 = vpop.f32.mrb[0].mxu1 }
  0xef   : > { %v609_v45 = vadd.f32 %v608_v43, %v3055_v39  ;;  %v962_v46 = vadd.f32 %v961_v44, %v3057_v40  ;;  %v610_v47 = vpop.f32.mrb[1].mxu0  ;;  %v963_v48 = vpop.f32.mrb[1].mxu1 }
  0xf0   : > { %v611_v50 = vadd.f32 %v610_v47, %v3059_v41  ;;  %v964_v51 = vadd.f32 %v963_v48, %v3061_v42  ;;  %v612_v52 = vpop.f32.mrb[2].mxu0  ;;  %v965_v53 = vpop.f32.mrb[2].mxu1 }
  0xf1   : > { %v613_v54 = vadd.f32 %v612_v52, %v3055_v39  ;;  %v966_v55 = vadd.f32 %v965_v53, %v3057_v40  ;;  %v614_v56 = vpop.f32.mrb[3].mxu0  ;;  %v967_v57 = vpop.f32.mrb[3].mxu1  ;;  %v1280_v60 = vmax.f32 %v609_v45, 0.0  ;;  %v1282_v61 = vmax.f32 %v962_v46, 0.0 }
  0xf2   : > { %v615_v58 = vadd.f32 %v614_v56, %v3059_v41  ;;  %v968_v59 = vadd.f32 %v967_v57, %v3061_v42  ;;  %v1281_v0 = vmax.f32 %v611_v50, 0.0  ;;  %v1283_v1 = vmax.f32 %v964_v51, 0.0  ;;  %v2729_v56 = vld [vmem:[%s2910_s11 + $0xe8] sm:$0xff]  }
  0xf3   : > { %v1284_v62 = vmax.f32 %v613_v54, 0.0  ;;  %v1286_v63 = vmax.f32 %v966_v55, 0.0  ;;  %2592 = vmatmul.mubr.msk.bf16.gmra.mrb[108].mxu0 %vm477_vm0, %v2727_v49  ;;  %2624 = vmatmul.mubr.msk.bf16.gmra.mrb[108].mxu1 %vm477_vm0, %v2727_v49  ;;  %v2813_v51 = vmov 0.0  }
  0xf4   : > { %v1285_v3 = vmax.f32 %v615_v58, 0.0  ;;  %v1287_v4 = vmax.f32 %v968_v59, 0.0  ;;  %886 = vmatprep.mubr.bf16.mxu0 %v2812_v2  ;;  %1239 = vmatprep.mubr.bf16.mxu1 %v2812_v2  ;;  %206 = vst.msk [vmem:[#allocation2] sm:$0xf] %vm3092_vm1, %v2813_v51 }
  0xf5   : > { %v2116_v5 = vadd.f32 %v1284_v62, %v1280_v60  ;;  %v2254_v6 = vadd.f32 %v1286_v63, %v1282_v61 }
  0xf6   : > { %v2185_v7 = vadd.f32 %v1285_v3, %v1281_v0  ;;  %v2323_v8 = vadd.f32 %v1287_v4, %v1283_v1  ;;  %v618_v9 = vpop.f32.mrb[4].mxu0  ;;  %v971_v10 = vpop.f32.mrb[4].mxu1 }
  0xf7   : > { %v619_v11 = vadd.f32 %v618_v9, %v3055_v39  ;;  %v972_v12 = vadd.f32 %v971_v10, %v3057_v40  ;;  %v620_v13 = vpop.f32.mrb[5].mxu0  ;;  %v973_v14 = vpop.f32.mrb[5].mxu1 }
  0xf8   : > { %v621_v16 = vadd.f32 %v620_v13, %v3059_v41  ;;  %v974_v17 = vadd.f32 %v973_v14, %v3061_v42  ;;  %v622_v18 = vpop.f32.mrb[6].mxu0  ;;  %v975_v19 = vpop.f32.mrb[6].mxu1 }
  0xf9   : > { %v1288_v20 = vmax.f32 %v619_v11, 0.0  ;;  %v1290_v21 = vmax.f32 %v972_v12, 0.0  ;;  %v623_v22 = vadd.f32 %v622_v18, %v3055_v39  ;;  %v976_v23 = vadd.f32 %v975_v19, %v3057_v40  ;;  %v624_v24 = vpop.f32.mrb[7].mxu0  ;;  %v977_v25 = vpop.f32.mrb[7].mxu1 }
  0xfa   : > { %v1289_v26 = vmax.f32 %v621_v16, 0.0  ;;  %v1291_v27 = vmax.f32 %v974_v17, 0.0  ;;  %v625_v28 = vadd.f32 %v624_v24, %v3059_v41  ;;  %v978_v29 = vadd.f32 %v977_v25, %v3061_v42  ;;  %v2730_v25 = vld [vmem:[%s2910_s11 + $0xf0] sm:$0xff]  }
  0xfb   : > { %v2117_v30 = vadd.f32 %v2116_v5, %v1288_v20  ;;  %v2255_v33 = vadd.f32 %v2254_v6, %v1290_v21  ;;  %v1292_v34 = vmax.f32 %v623_v22, 0.0  ;;  %v1294_v35 = vmax.f32 %v976_v23, 0.0  ;;  %2593 = vmatmul.mubr.msk.bf16.gmra.mrb[112].mxu0 %vm477_vm0, %v2728_v15  ;;  %2625 = vmatmul.mubr.msk.bf16.gmra.mrb[112].mxu1 %vm477_vm0, %v2728_v15 }
  0xfc   : > { %v2186_v36 = vadd.f32 %v2185_v7, %v1289_v26  ;;  %v2324_v37 = vadd.f32 %v2323_v8, %v1291_v27  ;;  %v1293_v38 = vmax.f32 %v625_v28, 0.0  ;;  %v1295_v43 = vmax.f32 %v978_v29, 0.0  ;;  %896 = vmatprep.mubr.bf16.mxu0 %v2812_v2  ;;  %1249 = vmatprep.mubr.bf16.mxu1 %v2812_v2 }
  0xfd   : > { %v2118_v44 = vadd.f32 %v2117_v30, %v1292_v34  ;;  %v2256_v45 = vadd.f32 %v2255_v33, %v1294_v35 }
  0xfe   : > { %v2187_v47 = vadd.f32 %v2186_v36, %v1293_v38  ;;  %v2325_v48 = vadd.f32 %v2324_v37, %v1295_v43  ;;  %v628_v49 = vpop.f32.mrb[8].mxu0  ;;  %v981_v50 = vpop.f32.mrb[8].mxu1 }
  0xff   : > { %v629_v52 = vadd.f32 %v628_v49, %v3055_v39  ;;  %v982_v53 = vadd.f32 %v981_v50, %v3057_v40  ;;  %v630_v54 = vpop.f32.mrb[9].mxu0  ;;  %v983_v55 = vpop.f32.mrb[9].mxu1 }
 0x100   : > { %v631_v31 = vadd.f32 %v630_v54, %v3059_v41  ;;  %v984_v57 = vadd.f32 %v983_v55, %v3061_v42  ;;  %v632_v58 = vpop.f32.mrb[10].mxu0  ;;  %v985_v59 = vpop.f32.mrb[10].mxu1 }
 0x101   : > { %v1296_v60 = vmax.f32 %v629_v52, 0.0  ;;  %v1298_v61 = vmax.f32 %v982_v53, 0.0  ;;  %v633_v62 = vadd.f32 %v632_v58, %v3055_v39  ;;  %v986_v63 = vadd.f32 %v985_v59, %v3057_v40  ;;  %v634_v0 = vpop.f32.mrb[11].mxu0  ;;  %v987_v1 = vpop.f32.mrb[11].mxu1 }
 0x102   : > { %v1297_v3 = vmax.f32 %v631_v31, 0.0  ;;  %v1299_v4 = vmax.f32 %v984_v57, 0.0  ;;  %v635_v5 = vadd.f32 %v634_v0, %v3059_v41  ;;  %v988_v6 = vadd.f32 %v987_v1, %v3061_v42  ;;  %v2731_v0 = vld [vmem:[%s2910_s11 + $0xf8] sm:$0xff]  }
 0x103   : > { %v2119_v7 = vadd.f32 %v2118_v44, %v1296_v60  ;;  %v2257_v8 = vadd.f32 %v2256_v45, %v1298_v61  ;;  %v1300_v9 = vmax.f32 %v633_v62, 0.0  ;;  %v1302_v10 = vmax.f32 %v986_v63, 0.0  ;;  %2594 = vmatmul.mubr.msk.bf16.gmra.mrb[116].mxu0 %vm477_vm0, %v2729_v56  ;;  %2626 = vmatmul.mubr.msk.bf16.gmra.mrb[116].mxu1 %vm477_vm0, %v2729_v56 }
 0x104   : > { %v2188_v11 = vadd.f32 %v2187_v47, %v1297_v3  ;;  %v2326_v12 = vadd.f32 %v2325_v48, %v1299_v4  ;;  %v1301_v13 = vmax.f32 %v635_v5, 0.0  ;;  %v1303_v14 = vmax.f32 %v988_v6, 0.0  ;;  %906 = vmatprep.mubr.bf16.mxu0 %v2812_v2  ;;  %1259 = vmatprep.mubr.bf16.mxu1 %v2812_v2 }
 0x105   : > { %v2120_v15 = vadd.f32 %v2119_v7, %v1300_v9  ;;  %v2258_v16 = vadd.f32 %v2257_v8, %v1302_v10 }
 0x106   : > { %v2189_v17 = vadd.f32 %v2188_v11, %v1301_v13  ;;  %v2327_v18 = vadd.f32 %v2326_v12, %v1303_v14  ;;  %v638_v19 = vpop.f32.mrb[12].mxu0  ;;  %v991_v20 = vpop.f32.mrb[12].mxu1 }
 0x107   : > { %v639_v21 = vadd.f32 %v638_v19, %v3055_v39  ;;  %v992_v22 = vadd.f32 %v991_v20, %v3057_v40  ;;  %v640_v23 = vpop.f32.mrb[13].mxu0  ;;  %v993_v24 = vpop.f32.mrb[13].mxu1 }
 0x108   : > { %v641_v26 = vadd.f32 %v640_v23, %v3059_v41  ;;  %v994_v27 = vadd.f32 %v993_v24, %v3061_v42  ;;  %v642_v28 = vpop.f32.mrb[14].mxu0  ;;  %v995_v29 = vpop.f32.mrb[14].mxu1 }
 0x109   : > { %v1304_v30 = vmax.f32 %v639_v21, 0.0  ;;  %v1306_v33 = vmax.f32 %v992_v22, 0.0  ;;  %v643_v34 = vadd.f32 %v642_v28, %v3055_v39  ;;  %v996_v35 = vadd.f32 %v995_v29, %v3057_v40  ;;  %v644_v36 = vpop.f32.mrb[15].mxu0  ;;  %v997_v37 = vpop.f32.mrb[15].mxu1 }
 0x10a   : > { %v1305_v38 = vmax.f32 %v641_v26, 0.0  ;;  %v1307_v43 = vmax.f32 %v994_v27, 0.0  ;;  %v645_v44 = vadd.f32 %v644_v36, %v3059_v41  ;;  %v998_v45 = vadd.f32 %v997_v37, %v3061_v42 }
 0x10b   : > { %v2121_v47 = vadd.f32 %v2120_v15, %v1304_v30  ;;  %v2259_v48 = vadd.f32 %v2258_v16, %v1306_v33  ;;  %v1308_v49 = vmax.f32 %v643_v34, 0.0  ;;  %v1310_v50 = vmax.f32 %v996_v35, 0.0  ;;  %2595 = vmatmul.mubr.msk.bf16.gmra.mrb[120].mxu0 %vm477_vm0, %v2730_v25  ;;  %2627 = vmatmul.mubr.msk.bf16.gmra.mrb[120].mxu1 %vm477_vm0, %v2730_v25 }
 0x10c   : > { %v2190_v51 = vadd.f32 %v2189_v17, %v1305_v38  ;;  %v2328_v52 = vadd.f32 %v2327_v18, %v1307_v43  ;;  %v1309_v53 = vmax.f32 %v645_v44, 0.0  ;;  %v1311_v54 = vmax.f32 %v998_v45, 0.0  ;;  %916 = vmatprep.mubr.bf16.mxu0 %v2812_v2  ;;  %1269 = vmatprep.mubr.bf16.mxu1 %v2812_v2 }
 0x10d   : > { %v2122_v55 = vadd.f32 %v2121_v47, %v1308_v49  ;;  %v2260_v56 = vadd.f32 %v2259_v48, %v1310_v50 }
 0x10e   : > { %v2191_v31 = vadd.f32 %v2190_v51, %v1309_v53  ;;  %v2329_v57 = vadd.f32 %v2328_v52, %v1311_v54  ;;  %v648_v58 = vpop.f32.mrb[16].mxu0  ;;  %v1001_v59 = vpop.f32.mrb[16].mxu1 }
 0x10f   : > { %v649_v60 = vadd.f32 %v648_v58, %v3055_v39  ;;  %v1002_v61 = vadd.f32 %v1001_v59, %v3057_v40  ;;  %v650_v62 = vpop.f32.mrb[17].mxu0  ;;  %v1003_v63 = vpop.f32.mrb[17].mxu1 }
 0x110   : > { %v651_v1 = vadd.f32 %v650_v62, %v3059_v41  ;;  %v1004_v3 = vadd.f32 %v1003_v63, %v3061_v42  ;;  %v652_v4 = vpop.f32.mrb[18].mxu0  ;;  %v1005_v5 = vpop.f32.mrb[18].mxu1 }
 0x111   : > { %v1312_v2 = vmax.f32 %v649_v60, 0.0  ;;  %v1314_v6 = vmax.f32 %v1002_v61, 0.0  ;;  %v653_v7 = vadd.f32 %v652_v4, %v3055_v39  ;;  %v1006_v8 = vadd.f32 %v1005_v5, %v3057_v40  ;;  %v654_v9 = vpop.f32.mrb[19].mxu0  ;;  %v1007_v10 = vpop.f32.mrb[19].mxu1 }
 0x112   : > { %v1313_v11 = vmax.f32 %v651_v1, 0.0  ;;  %v1315_v12 = vmax.f32 %v1004_v3, 0.0  ;;  %v655_v13 = vadd.f32 %v654_v9, %v3059_v41  ;;  %v1008_v14 = vadd.f32 %v1007_v10, %v3061_v42 }
 0x113   : > { %v2123_v15 = vadd.f32 %v2122_v55, %v1312_v2  ;;  %v2261_v16 = vadd.f32 %v2260_v56, %v1314_v6  ;;  %v1316_v17 = vmax.f32 %v653_v7, 0.0  ;;  %v1318_v18 = vmax.f32 %v1006_v8, 0.0  ;;  %2596 = vmatmul.mubr.msk.bf16.gmra.mrb[124].mxu0 %vm477_vm0, %v2731_v0  ;;  %2628 = vmatmul.mubr.msk.bf16.gmra.mrb[124].mxu1 %vm477_vm0, %v2731_v0 }
 0x114   : > { %v2192_v19 = vadd.f32 %v2191_v31, %v1313_v11  ;;  %v2330_v20 = vadd.f32 %v2329_v57, %v1315_v12  ;;  %v1317_v21 = vmax.f32 %v655_v13, 0.0  ;;  %v1319_v22 = vmax.f32 %v1008_v14, 0.0 }
 0x115   : > { %v2124_v23 = vadd.f32 %v2123_v15, %v1316_v17  ;;  %v2262_v24 = vadd.f32 %v2261_v16, %v1318_v18 }
 0x116   : > { %v2193_v25 = vadd.f32 %v2192_v19, %v1317_v21  ;;  %v2331_v26 = vadd.f32 %v2330_v20, %v1319_v22  ;;  %v658_v27 = vpop.f32.mrb[20].mxu0  ;;  %v1011_v28 = vpop.f32.mrb[20].mxu1 }
 0x117   : > { %v659_v29 = vadd.f32 %v658_v27, %v3055_v39  ;;  %v1012_v30 = vadd.f32 %v1011_v28, %v3057_v40  ;;  %v660_v33 = vpop.f32.mrb[21].mxu0  ;;  %v1013_v34 = vpop.f32.mrb[21].mxu1 }
 0x118   : > { %v661_v35 = vadd.f32 %v660_v33, %v3059_v41  ;;  %v1014_v36 = vadd.f32 %v1013_v34, %v3061_v42  ;;  %v662_v37 = vpop.f32.mrb[22].mxu0  ;;  %v1015_v38 = vpop.f32.mrb[22].mxu1 }
 0x119   : > { %v1320_v43 = vmax.f32 %v659_v29, 0.0  ;;  %v1322_v44 = vmax.f32 %v1012_v30, 0.0  ;;  %v663_v45 = vadd.f32 %v662_v37, %v3055_v39  ;;  %v1016_v47 = vadd.f32 %v1015_v38, %v3057_v40  ;;  %v664_v48 = vpop.f32.mrb[23].mxu0  ;;  %v1017_v49 = vpop.f32.mrb[23].mxu1 }
 0x11a   : > { %v1321_v50 = vmax.f32 %v661_v35, 0.0  ;;  %v1323_v51 = vmax.f32 %v1014_v36, 0.0  ;;  %v665_v52 = vadd.f32 %v664_v48, %v3059_v41  ;;  %v1018_v53 = vadd.f32 %v1017_v49, %v3061_v42 }
 0x11b   : > { %v2125_v54 = vadd.f32 %v2124_v23, %v1320_v43  ;;  %v2263_v55 = vadd.f32 %v2262_v24, %v1322_v44  ;;  %v1324_v56 = vmax.f32 %v663_v45, 0.0  ;;  %v1326_v31 = vmax.f32 %v1016_v47, 0.0 }
 0x11c   : > { %v2194_v57 = vadd.f32 %v2193_v25, %v1321_v50  ;;  %v2332_v58 = vadd.f32 %v2331_v26, %v1323_v51  ;;  %v1325_v59 = vmax.f32 %v665_v52, 0.0  ;;  %v1327_v60 = vmax.f32 %v1018_v53, 0.0 }
 0x11d   : > { %v2126_v61 = vadd.f32 %v2125_v54, %v1324_v56  ;;  %v2264_v62 = vadd.f32 %v2263_v55, %v1326_v31 }
 0x11e   : > { %v2195_v63 = vadd.f32 %v2194_v57, %v1325_v59  ;;  %v2333_v0 = vadd.f32 %v2332_v58, %v1327_v60  ;;  %v668_v1 = vpop.f32.mrb[24].mxu0  ;;  %v1021_v3 = vpop.f32.mrb[24].mxu1 }
 0x11f   : > { %v669_v4 = vadd.f32 %v668_v1, %v3055_v39  ;;  %v1022_v5 = vadd.f32 %v1021_v3, %v3057_v40  ;;  %v670_v2 = vpop.f32.mrb[25].mxu0  ;;  %v1023_v6 = vpop.f32.mrb[25].mxu1 }
 0x120   : > { %v671_v7 = vadd.f32 %v670_v2, %v3059_v41  ;;  %v1024_v8 = vadd.f32 %v1023_v6, %v3061_v42  ;;  %v672_v9 = vpop.f32.mrb[26].mxu0  ;;  %v1025_v10 = vpop.f32.mrb[26].mxu1 }
 0x121   : > { %v1328_v11 = vmax.f32 %v669_v4, 0.0  ;;  %v1330_v12 = vmax.f32 %v1022_v5, 0.0  ;;  %v673_v13 = vadd.f32 %v672_v9, %v3055_v39  ;;  %v1026_v14 = vadd.f32 %v1025_v10, %v3057_v40  ;;  %v674_v15 = vpop.f32.mrb[27].mxu0  ;;  %v1027_v16 = vpop.f32.mrb[27].mxu1 }
 0x122   : > { %v1329_v17 = vmax.f32 %v671_v7, 0.0  ;;  %v1331_v18 = vmax.f32 %v1024_v8, 0.0  ;;  %v675_v19 = vadd.f32 %v674_v15, %v3059_v41  ;;  %v1028_v20 = vadd.f32 %v1027_v16, %v3061_v42 }
 0x123   : > { %v2127_v21 = vadd.f32 %v2126_v61, %v1328_v11  ;;  %v2265_v22 = vadd.f32 %v2264_v62, %v1330_v12  ;;  %v1332_v23 = vmax.f32 %v673_v13, 0.0  ;;  %v1334_v24 = vmax.f32 %v1026_v14, 0.0 }
 0x124   : > { %v2196_v25 = vadd.f32 %v2195_v63, %v1329_v17  ;;  %v2334_v26 = vadd.f32 %v2333_v0, %v1331_v18  ;;  %v1333_v27 = vmax.f32 %v675_v19, 0.0  ;;  %v1335_v28 = vmax.f32 %v1028_v20, 0.0 }
 0x125   : > { %v2128_v29 = vadd.f32 %v2127_v21, %v1332_v23  ;;  %v2266_v30 = vadd.f32 %v2265_v22, %v1334_v24 }
 0x126   : > { %v2197_v33 = vadd.f32 %v2196_v25, %v1333_v27  ;;  %v2335_v34 = vadd.f32 %v2334_v26, %v1335_v28  ;;  %v678_v35 = vpop.f32.mrb[28].mxu0  ;;  %v1031_v36 = vpop.f32.mrb[28].mxu1 }
 0x127   : > { %v679_v37 = vadd.f32 %v678_v35, %v3055_v39  ;;  %v1032_v38 = vadd.f32 %v1031_v36, %v3057_v40  ;;  %v680_v43 = vpop.f32.mrb[29].mxu0  ;;  %v1033_v44 = vpop.f32.mrb[29].mxu1 }
 0x128   : > { %v681_v45 = vadd.f32 %v680_v43, %v3059_v41  ;;  %v1034_v47 = vadd.f32 %v1033_v44, %v3061_v42  ;;  %v682_v48 = vpop.f32.mrb[30].mxu0  ;;  %v1035_v49 = vpop.f32.mrb[30].mxu1 }
 0x129   : > { %v1336_v50 = vmax.f32 %v679_v37, 0.0  ;;  %v1338_v51 = vmax.f32 %v1032_v38, 0.0  ;;  %v683_v52 = vadd.f32 %v682_v48, %v3055_v39  ;;  %v1036_v53 = vadd.f32 %v1035_v49, %v3057_v40  ;;  %v684_v54 = vpop.f32.mrb[31].mxu0  ;;  %v1037_v55 = vpop.f32.mrb[31].mxu1 }
 0x12a   : > { %v1337_v56 = vmax.f32 %v681_v45, 0.0  ;;  %v1339_v31 = vmax.f32 %v1034_v47, 0.0  ;;  %v685_v57 = vadd.f32 %v684_v54, %v3059_v41  ;;  %v1038_v58 = vadd.f32 %v1037_v55, %v3061_v42 }
 0x12b   : > { %v2129_v59 = vadd.f32 %v2128_v29, %v1336_v50  ;;  %v2267_v60 = vadd.f32 %v2266_v30, %v1338_v51  ;;  %v1340_v61 = vmax.f32 %v683_v52, 0.0  ;;  %v1342_v62 = vmax.f32 %v1036_v53, 0.0 }
 0x12c   : > { %v2198_v63 = vadd.f32 %v2197_v33, %v1337_v56  ;;  %v2336_v0 = vadd.f32 %v2335_v34, %v1339_v31  ;;  %v1341_v1 = vmax.f32 %v685_v57, 0.0  ;;  %v1343_v3 = vmax.f32 %v1038_v58, 0.0 }
 0x12d   : > { %v2130_v4 = vadd.f32 %v2129_v59, %v1340_v61  ;;  %v2268_v5 = vadd.f32 %v2267_v60, %v1342_v62 }
 0x12e   : > { %v2199_v2 = vadd.f32 %v2198_v63, %v1341_v1  ;;  %v2337_v6 = vadd.f32 %v2336_v0, %v1343_v3  ;;  %v688_v7 = vpop.f32.mrb[32].mxu0  ;;  %v1041_v8 = vpop.f32.mrb[32].mxu1 }
 0x12f   : > { %v689_v9 = vadd.f32 %v688_v7, %v3055_v39  ;;  %v1042_v10 = vadd.f32 %v1041_v8, %v3057_v40  ;;  %v690_v11 = vpop.f32.mrb[33].mxu0  ;;  %v1043_v12 = vpop.f32.mrb[33].mxu1 }
 0x130   : > { %v691_v13 = vadd.f32 %v690_v11, %v3059_v41  ;;  %v1044_v14 = vadd.f32 %v1043_v12, %v3061_v42  ;;  %v692_v15 = vpop.f32.mrb[34].mxu0  ;;  %v1045_v16 = vpop.f32.mrb[34].mxu1 }
 0x131   : > { %v1344_v17 = vmax.f32 %v689_v9, 0.0  ;;  %v1346_v18 = vmax.f32 %v1042_v10, 0.0  ;;  %v693_v19 = vadd.f32 %v692_v15, %v3055_v39  ;;  %v1046_v20 = vadd.f32 %v1045_v16, %v3057_v40  ;;  %v694_v21 = vpop.f32.mrb[35].mxu0  ;;  %v1047_v22 = vpop.f32.mrb[35].mxu1 }
 0x132   : > { %v1345_v23 = vmax.f32 %v691_v13, 0.0  ;;  %v1347_v24 = vmax.f32 %v1044_v14, 0.0  ;;  %v695_v25 = vadd.f32 %v694_v21, %v3059_v41  ;;  %v1048_v26 = vadd.f32 %v1047_v22, %v3061_v42 }
 0x133   : > { %v2131_v27 = vadd.f32 %v2130_v4, %v1344_v17  ;;  %v2269_v28 = vadd.f32 %v2268_v5, %v1346_v18  ;;  %v1348_v29 = vmax.f32 %v693_v19, 0.0  ;;  %v1350_v30 = vmax.f32 %v1046_v20, 0.0 }
 0x134   : > { %v2200_v33 = vadd.f32 %v2199_v2, %v1345_v23  ;;  %v2338_v34 = vadd.f32 %v2337_v6, %v1347_v24  ;;  %v1349_v35 = vmax.f32 %v695_v25, 0.0  ;;  %v1351_v36 = vmax.f32 %v1048_v26, 0.0 }
 0x135   : > { %v2132_v37 = vadd.f32 %v2131_v27, %v1348_v29  ;;  %v2270_v38 = vadd.f32 %v2269_v28, %v1350_v30 }
 0x136   : > { %v2201_v43 = vadd.f32 %v2200_v33, %v1349_v35  ;;  %v2339_v44 = vadd.f32 %v2338_v34, %v1351_v36  ;;  %v698_v45 = vpop.f32.mrb[36].mxu0  ;;  %v1051_v47 = vpop.f32.mrb[36].mxu1 }
 0x137   : > { %v699_v48 = vadd.f32 %v698_v45, %v3055_v39  ;;  %v1052_v49 = vadd.f32 %v1051_v47, %v3057_v40  ;;  %v700_v50 = vpop.f32.mrb[37].mxu0  ;;  %v1053_v51 = vpop.f32.mrb[37].mxu1 }
 0x138   : > { %v701_v52 = vadd.f32 %v700_v50, %v3059_v41  ;;  %v1054_v53 = vadd.f32 %v1053_v51, %v3061_v42  ;;  %v702_v54 = vpop.f32.mrb[38].mxu0  ;;  %v1055_v55 = vpop.f32.mrb[38].mxu1 }
 0x139   : > { %v1352_v56 = vmax.f32 %v699_v48, 0.0  ;;  %v1354_v31 = vmax.f32 %v1052_v49, 0.0  ;;  %v703_v57 = vadd.f32 %v702_v54, %v3055_v39  ;;  %v1056_v58 = vadd.f32 %v1055_v55, %v3057_v40  ;;  %v704_v59 = vpop.f32.mrb[39].mxu0  ;;  %v1057_v60 = vpop.f32.mrb[39].mxu1 }
 0x13a   : > { %v1353_v61 = vmax.f32 %v701_v52, 0.0  ;;  %v1355_v62 = vmax.f32 %v1054_v53, 0.0  ;;  %v705_v63 = vadd.f32 %v704_v59, %v3059_v41  ;;  %v1058_v0 = vadd.f32 %v1057_v60, %v3061_v42 }
 0x13b   : > { %v2133_v1 = vadd.f32 %v2132_v37, %v1352_v56  ;;  %v2271_v3 = vadd.f32 %v2270_v38, %v1354_v31  ;;  %v1356_v4 = vmax.f32 %v703_v57, 0.0  ;;  %v1358_v5 = vmax.f32 %v1056_v58, 0.0 }
 0x13c   : > { %v2202_v2 = vadd.f32 %v2201_v43, %v1353_v61  ;;  %v2340_v6 = vadd.f32 %v2339_v44, %v1355_v62  ;;  %v1357_v7 = vmax.f32 %v705_v63, 0.0  ;;  %v1359_v8 = vmax.f32 %v1058_v0, 0.0 }
 0x13d   : > { %v2134_v9 = vadd.f32 %v2133_v1, %v1356_v4  ;;  %v2272_v10 = vadd.f32 %v2271_v3, %v1358_v5 }
 0x13e   : > { %v2203_v11 = vadd.f32 %v2202_v2, %v1357_v7  ;;  %v2341_v12 = vadd.f32 %v2340_v6, %v1359_v8  ;;  %v708_v13 = vpop.f32.mrb[40].mxu0  ;;  %v1061_v14 = vpop.f32.mrb[40].mxu1 }
 0x13f   : > { %v709_v15 = vadd.f32 %v708_v13, %v3055_v39  ;;  %v1062_v16 = vadd.f32 %v1061_v14, %v3057_v40  ;;  %v710_v17 = vpop.f32.mrb[41].mxu0  ;;  %v1063_v18 = vpop.f32.mrb[41].mxu1 }
 0x140   : > { %v711_v19 = vadd.f32 %v710_v17, %v3059_v41  ;;  %v1064_v20 = vadd.f32 %v1063_v18, %v3061_v42  ;;  %v712_v21 = vpop.f32.mrb[42].mxu0  ;;  %v1065_v22 = vpop.f32.mrb[42].mxu1 }
 0x141   : > { %v1360_v23 = vmax.f32 %v709_v15, 0.0  ;;  %v1362_v24 = vmax.f32 %v1062_v16, 0.0  ;;  %v713_v25 = vadd.f32 %v712_v21, %v3055_v39  ;;  %v1066_v26 = vadd.f32 %v1065_v22, %v3057_v40  ;;  %v714_v27 = vpop.f32.mrb[43].mxu0  ;;  %v1067_v28 = vpop.f32.mrb[43].mxu1 }
 0x142   : > { %v1361_v29 = vmax.f32 %v711_v19, 0.0  ;;  %v1363_v30 = vmax.f32 %v1064_v20, 0.0  ;;  %v715_v33 = vadd.f32 %v714_v27, %v3059_v41  ;;  %v1068_v34 = vadd.f32 %v1067_v28, %v3061_v42 }
 0x143   : > { %v2135_v35 = vadd.f32 %v2134_v9, %v1360_v23  ;;  %v2273_v36 = vadd.f32 %v2272_v10, %v1362_v24  ;;  %v1364_v37 = vmax.f32 %v713_v25, 0.0  ;;  %v1366_v38 = vmax.f32 %v1066_v26, 0.0 }
 0x144   : > { %v2204_v43 = vadd.f32 %v2203_v11, %v1361_v29  ;;  %v2342_v44 = vadd.f32 %v2341_v12, %v1363_v30  ;;  %v1365_v45 = vmax.f32 %v715_v33, 0.0  ;;  %v1367_v47 = vmax.f32 %v1068_v34, 0.0 }
 0x145   : > { %v2136_v48 = vadd.f32 %v2135_v35, %v1364_v37  ;;  %v2274_v49 = vadd.f32 %v2273_v36, %v1366_v38 }
 0x146   : > { %v2205_v50 = vadd.f32 %v2204_v43, %v1365_v45  ;;  %v2343_v51 = vadd.f32 %v2342_v44, %v1367_v47  ;;  %v718_v52 = vpop.f32.mrb[44].mxu0  ;;  %v1071_v53 = vpop.f32.mrb[44].mxu1 }
 0x147   : > { %v719_v54 = vadd.f32 %v718_v52, %v3055_v39  ;;  %v1072_v55 = vadd.f32 %v1071_v53, %v3057_v40  ;;  %v720_v56 = vpop.f32.mrb[45].mxu0  ;;  %v1073_v31 = vpop.f32.mrb[45].mxu1 }
 0x148   : > { %v721_v57 = vadd.f32 %v720_v56, %v3059_v41  ;;  %v1074_v58 = vadd.f32 %v1073_v31, %v3061_v42  ;;  %v722_v59 = vpop.f32.mrb[46].mxu0  ;;  %v1075_v60 = vpop.f32.mrb[46].mxu1 }
 0x149   : > { %v1368_v61 = vmax.f32 %v719_v54, 0.0  ;;  %v1370_v62 = vmax.f32 %v1072_v55, 0.0  ;;  %v723_v63 = vadd.f32 %v722_v59, %v3055_v39  ;;  %v1076_v0 = vadd.f32 %v1075_v60, %v3057_v40  ;;  %v724_v1 = vpop.f32.mrb[47].mxu0  ;;  %v1077_v3 = vpop.f32.mrb[47].mxu1 }
 0x14a   : > { %v1369_v4 = vmax.f32 %v721_v57, 0.0  ;;  %v1371_v5 = vmax.f32 %v1074_v58, 0.0  ;;  %v725_v2 = vadd.f32 %v724_v1, %v3059_v41  ;;  %v1078_v6 = vadd.f32 %v1077_v3, %v3061_v42 }
 0x14b   : > { %v2137_v7 = vadd.f32 %v2136_v48, %v1368_v61  ;;  %v2275_v8 = vadd.f32 %v2274_v49, %v1370_v62  ;;  %v1372_v9 = vmax.f32 %v723_v63, 0.0  ;;  %v1374_v10 = vmax.f32 %v1076_v0, 0.0 }
 0x14c   : > { %v2206_v11 = vadd.f32 %v2205_v50, %v1369_v4  ;;  %v2344_v12 = vadd.f32 %v2343_v51, %v1371_v5  ;;  %v1373_v13 = vmax.f32 %v725_v2, 0.0  ;;  %v1375_v14 = vmax.f32 %v1078_v6, 0.0 }
 0x14d   : > { %v2138_v15 = vadd.f32 %v2137_v7, %v1372_v9  ;;  %v2276_v16 = vadd.f32 %v2275_v8, %v1374_v10 }
 0x14e   : > { %v2207_v17 = vadd.f32 %v2206_v11, %v1373_v13  ;;  %v2345_v18 = vadd.f32 %v2344_v12, %v1375_v14  ;;  %v728_v19 = vpop.f32.mrb[48].mxu0  ;;  %v1081_v20 = vpop.f32.mrb[48].mxu1 }
 0x14f   : > { %v729_v21 = vadd.f32 %v728_v19, %v3055_v39  ;;  %v1082_v22 = vadd.f32 %v1081_v20, %v3057_v40  ;;  %v730_v23 = vpop.f32.mrb[49].mxu0  ;;  %v1083_v24 = vpop.f32.mrb[49].mxu1 }
 0x150   : > { %v731_v25 = vadd.f32 %v730_v23, %v3059_v41  ;;  %v1084_v26 = vadd.f32 %v1083_v24, %v3061_v42  ;;  %v732_v27 = vpop.f32.mrb[50].mxu0  ;;  %v1085_v28 = vpop.f32.mrb[50].mxu1 }
 0x151   : > { %v1376_v29 = vmax.f32 %v729_v21, 0.0  ;;  %v1378_v30 = vmax.f32 %v1082_v22, 0.0  ;;  %v733_v33 = vadd.f32 %v732_v27, %v3055_v39  ;;  %v1086_v34 = vadd.f32 %v1085_v28, %v3057_v40  ;;  %v734_v35 = vpop.f32.mrb[51].mxu0  ;;  %v1087_v36 = vpop.f32.mrb[51].mxu1 }
 0x152   : > { %v1377_v37 = vmax.f32 %v731_v25, 0.0  ;;  %v1379_v38 = vmax.f32 %v1084_v26, 0.0  ;;  %v735_v43 = vadd.f32 %v734_v35, %v3059_v41  ;;  %v1088_v44 = vadd.f32 %v1087_v36, %v3061_v42 }
 0x153   : > { %v2139_v45 = vadd.f32 %v2138_v15, %v1376_v29  ;;  %v2277_v47 = vadd.f32 %v2276_v16, %v1378_v30  ;;  %v1380_v48 = vmax.f32 %v733_v33, 0.0  ;;  %v1382_v49 = vmax.f32 %v1086_v34, 0.0 }
 0x154   : > { %v2208_v50 = vadd.f32 %v2207_v17, %v1377_v37  ;;  %v2346_v51 = vadd.f32 %v2345_v18, %v1379_v38  ;;  %v1381_v52 = vmax.f32 %v735_v43, 0.0  ;;  %v1383_v53 = vmax.f32 %v1088_v44, 0.0 }
 0x155   : > { %v2140_v54 = vadd.f32 %v2139_v45, %v1380_v48  ;;  %v2278_v55 = vadd.f32 %v2277_v47, %v1382_v49 }
 0x156   : > { %v2209_v56 = vadd.f32 %v2208_v50, %v1381_v52  ;;  %v2347_v31 = vadd.f32 %v2346_v51, %v1383_v53  ;;  %v738_v57 = vpop.f32.mrb[52].mxu0  ;;  %v1091_v58 = vpop.f32.mrb[52].mxu1 }
 0x157   : > { %v739_v59 = vadd.f32 %v738_v57, %v3055_v39  ;;  %v1092_v60 = vadd.f32 %v1091_v58, %v3057_v40  ;;  %v740_v61 = vpop.f32.mrb[53].mxu0  ;;  %v1093_v62 = vpop.f32.mrb[53].mxu1 }
 0x158   : > { %v741_v63 = vadd.f32 %v740_v61, %v3059_v41  ;;  %v1094_v0 = vadd.f32 %v1093_v62, %v3061_v42  ;;  %v742_v1 = vpop.f32.mrb[54].mxu0  ;;  %v1095_v3 = vpop.f32.mrb[54].mxu1 }
 0x159   : > { %v1384_v4 = vmax.f32 %v739_v59, 0.0  ;;  %v1386_v5 = vmax.f32 %v1092_v60, 0.0  ;;  %v743_v2 = vadd.f32 %v742_v1, %v3055_v39  ;;  %v1096_v6 = vadd.f32 %v1095_v3, %v3057_v40  ;;  %v744_v7 = vpop.f32.mrb[55].mxu0  ;;  %v1097_v8 = vpop.f32.mrb[55].mxu1 }
 0x15a   : > { %v1385_v9 = vmax.f32 %v741_v63, 0.0  ;;  %v1387_v10 = vmax.f32 %v1094_v0, 0.0  ;;  %v745_v11 = vadd.f32 %v744_v7, %v3059_v41  ;;  %v1098_v12 = vadd.f32 %v1097_v8, %v3061_v42 }
 0x15b   : > { %v2141_v13 = vadd.f32 %v2140_v54, %v1384_v4  ;;  %v2279_v14 = vadd.f32 %v2278_v55, %v1386_v5  ;;  %v1388_v15 = vmax.f32 %v743_v2, 0.0  ;;  %v1390_v16 = vmax.f32 %v1096_v6, 0.0 }
 0x15c   : > { %v2210_v17 = vadd.f32 %v2209_v56, %v1385_v9  ;;  %v2348_v18 = vadd.f32 %v2347_v31, %v1387_v10  ;;  %v1389_v19 = vmax.f32 %v745_v11, 0.0  ;;  %v1391_v20 = vmax.f32 %v1098_v12, 0.0 }
 0x15d   : > { %v2142_v21 = vadd.f32 %v2141_v13, %v1388_v15  ;;  %v2280_v22 = vadd.f32 %v2279_v14, %v1390_v16 }
 0x15e   : > { %v2211_v23 = vadd.f32 %v2210_v17, %v1389_v19  ;;  %v2349_v24 = vadd.f32 %v2348_v18, %v1391_v20  ;;  %v748_v25 = vpop.f32.mrb[56].mxu0  ;;  %v1101_v26 = vpop.f32.mrb[56].mxu1 }
 0x15f   : > { %v749_v27 = vadd.f32 %v748_v25, %v3055_v39  ;;  %v1102_v28 = vadd.f32 %v1101_v26, %v3057_v40  ;;  %v750_v29 = vpop.f32.mrb[57].mxu0  ;;  %v1103_v30 = vpop.f32.mrb[57].mxu1 }
 0x160   : > { %v751_v33 = vadd.f32 %v750_v29, %v3059_v41  ;;  %v1104_v34 = vadd.f32 %v1103_v30, %v3061_v42  ;;  %v752_v35 = vpop.f32.mrb[58].mxu0  ;;  %v1105_v36 = vpop.f32.mrb[58].mxu1 }
 0x161   : > { %v1392_v37 = vmax.f32 %v749_v27, 0.0  ;;  %v1394_v38 = vmax.f32 %v1102_v28, 0.0  ;;  %v753_v43 = vadd.f32 %v752_v35, %v3055_v39  ;;  %v1106_v44 = vadd.f32 %v1105_v36, %v3057_v40  ;;  %v754_v45 = vpop.f32.mrb[59].mxu0  ;;  %v1107_v47 = vpop.f32.mrb[59].mxu1 }
 0x162   : > { %v1393_v48 = vmax.f32 %v751_v33, 0.0  ;;  %v1395_v49 = vmax.f32 %v1104_v34, 0.0  ;;  %v755_v50 = vadd.f32 %v754_v45, %v3059_v41  ;;  %v1108_v51 = vadd.f32 %v1107_v47, %v3061_v42 }
 0x163   : > { %v2143_v52 = vadd.f32 %v2142_v21, %v1392_v37  ;;  %v2281_v53 = vadd.f32 %v2280_v22, %v1394_v38  ;;  %v1396_v54 = vmax.f32 %v753_v43, 0.0  ;;  %v1398_v55 = vmax.f32 %v1106_v44, 0.0 }
 0x164   : > { %v2212_v56 = vadd.f32 %v2211_v23, %v1393_v48  ;;  %v2350_v31 = vadd.f32 %v2349_v24, %v1395_v49  ;;  %v1397_v57 = vmax.f32 %v755_v50, 0.0  ;;  %v1399_v58 = vmax.f32 %v1108_v51, 0.0 }
 0x165   : > { %v2144_v59 = vadd.f32 %v2143_v52, %v1396_v54  ;;  %v2282_v60 = vadd.f32 %v2281_v53, %v1398_v55  ;;  %v2814_v50 = vmov 1966171168  }
 0x166   : > { %v2213_v61 = vadd.f32 %v2212_v56, %v1397_v57  ;;  %v2351_v62 = vadd.f32 %v2350_v31, %v1399_v58  ;;  %v758_v63 = vpop.f32.mrb[60].mxu0  ;;  %v1111_v0 = vpop.f32.mrb[60].mxu1  ;;  %v2399_v51 = vunpack.c.l.s4 %v2814_v50 }
 0x167   : > { %v759_v1 = vadd.f32 %v758_v63, %v3055_v39  ;;  %v1112_v3 = vadd.f32 %v1111_v0, %v3057_v40  ;;  %v760_v4 = vpop.f32.mrb[61].mxu0  ;;  %v1113_v5 = vpop.f32.mrb[61].mxu1 }
 0x168   : > { %v761_v2 = vadd.f32 %v760_v4, %v3059_v41  ;;  %v1114_v6 = vadd.f32 %v1113_v5, %v3061_v42  ;;  %v762_v7 = vpop.f32.mrb[62].mxu0  ;;  %v1115_v8 = vpop.f32.mrb[62].mxu1 }
 0x169   : > { %v1400_v9 = vmax.f32 %v759_v1, 0.0  ;;  %v1402_v10 = vmax.f32 %v1112_v3, 0.0  ;;  %v763_v11 = vadd.f32 %v762_v7, %v3055_v39  ;;  %v1116_v12 = vadd.f32 %v1115_v8, %v3057_v40  ;;  %v764_v13 = vpop.f32.mrb[63].mxu0  ;;  %v1117_v14 = vpop.f32.mrb[63].mxu1 }
 0x16a   : > { %v1401_v15 = vmax.f32 %v761_v2, 0.0  ;;  %v1403_v16 = vmax.f32 %v1114_v6, 0.0  ;;  %v765_v17 = vadd.f32 %v764_v13, %v3059_v41  ;;  %v1118_v18 = vadd.f32 %v1117_v14, %v3061_v42 }
 0x16b   : > { %v2145_v19 = vadd.f32 %v2144_v59, %v1400_v9  ;;  %v2283_v20 = vadd.f32 %v2282_v60, %v1402_v10  ;;  %v1404_v21 = vmax.f32 %v763_v11, 0.0  ;;  %v1406_v22 = vmax.f32 %v1116_v12, 0.0 }
 0x16c   : > { %v2214_v23 = vadd.f32 %v2213_v61, %v1401_v15  ;;  %v2352_v24 = vadd.f32 %v2351_v62, %v1403_v16  ;;  %v1405_v25 = vmax.f32 %v765_v17, 0.0  ;;  %v1407_v26 = vmax.f32 %v1118_v18, 0.0 }
 0x16d   : > { %v2146_v27 = vadd.f32 %v2145_v19, %v1404_v21  ;;  %v2284_v39 = vadd.f32 %v2283_v20, %v1406_v22  ;;  %v2400_v61 = vunpack.c.0.s8 %v2399_v51 }
 0x16e   : > { %v2215_v28 = vadd.f32 %v2214_v23, %v1405_v25  ;;  %v2353_v40 = vadd.f32 %v2352_v24, %v1407_v26  ;;  %v768_v29 = vpop.f32.mrb[64].mxu0  ;;  %v1121_v30 = vpop.f32.mrb[64].mxu1  ;;  %v2115_v26 = vld [vmem:[#allocation2] sm:$0xf] }
 0x16f   : > { %v2179_v33 = vrot.slane %v2146_v27, 4  ;;  %v2317_v34 = vrot.slane %v2284_v39, 4  ;;  %v770_v35 = vpop.f32.mrb[65].mxu0  ;;  %v1123_v41 = vpop.f32.mrb[65].mxu1  ;;  %v2403_v12 = vsub.s32 %v2400_v61, %v3041_v32 }
 0x170   : > { %v2248_v36 = vrot.slane %v2215_v28, 4  ;;  %v2386_v42 = vrot.slane %v2353_v40, 4  ;;  %v772_v37 = vpop.f32.mrb[66].mxu0  ;;  %v1125_v38 = vpop.f32.mrb[66].mxu1 }
 0x171   : > { %v2180_v43 = vadd.f32 %v2179_v33, %v2146_v27  ;;  %v2318_v44 = vadd.f32 %v2317_v34, %v2284_v39  ;;  %v774_v45 = vpop.f32.mrb[67].mxu0  ;;  %v1127_v47 = vpop.f32.mrb[67].mxu1 }
 0x172   : > { %v2249_v48 = vadd.f32 %v2248_v36, %v2215_v28  ;;  %v2387_v49 = vadd.f32 %v2386_v42, %v2353_v40 }
 0x173   : > { %v2181_v52 = vrot.slane %v2180_v43, 2  ;;  %v2319_v53 = vrot.slane %v2318_v44, 2 }
 0x174   : > { %v2250_v54 = vrot.slane %v2249_v48, 2  ;;  %v2388_v55 = vrot.slane %v2387_v49, 2 }
 0x175   : > { %v2182_v56 = vadd.f32 %v2181_v52, %v2180_v43  ;;  %v2320_v31 = vadd.f32 %v2319_v53, %v2318_v44 }
 0x176   : > { %v2251_v57 = vadd.f32 %v2250_v54, %v2249_v48  ;;  %v2389_v58 = vadd.f32 %v2388_v55, %v2387_v49  ;;  %v778_v59 = vpop.f32.mrb[68].mxu0  ;;  %v1131_v60 = vpop.f32.mrb[68].mxu1 }
 0x177   : > { %v2183_v62 = vrot.slane %v2182_v56, 1  ;;  %v2321_v63 = vrot.slane %v2320_v31, 1  ;;  %v780_v0 = vpop.f32.mrb[69].mxu0  ;;  %v1133_v1 = vpop.f32.mrb[69].mxu1 }
 0x178   : > { %v2252_v3 = vrot.slane %v2251_v57, 1  ;;  %v2390_v4 = vrot.slane %v2389_v58, 1  ;;  %v782_v5 = vpop.f32.mrb[70].mxu0  ;;  %v1135_v2 = vpop.f32.mrb[70].mxu1 }
 0x179   : > { %v2184_v6 = vadd.f32 %v2183_v62, %v2182_v56  ;;  %v2322_v7 = vadd.f32 %v2321_v63, %v2320_v31  ;;  %v784_v8 = vpop.f32.mrb[71].mxu0  ;;  %v1137_v9 = vpop.f32.mrb[71].mxu1 }
 0x17a   : > { %v2253_v10 = vadd.f32 %v2252_v3, %v2251_v57  ;;  %v2391_v11 = vadd.f32 %v2390_v4, %v2389_v58 }
 0x17c   : > { %v2396_v13 = vcombine.low %v2184_v6, %v2253_v10  ;;  %v2397_v14 = vcombine.low %v2322_v7, %v2391_v11 }
 0x17e   : > { %v788_v15 = vpop.f32.mrb[72].mxu0  ;;  %v1141_v16 = vpop.f32.mrb[72].mxu1  ;;  %v2404_v17 = vrot.slane %v2396_v13, %v2403_v12  ;;  %v2411_v18 = vrot.slane %v2397_v14, %v2403_v12 }
 0x17f   : > { %v790_v19 = vpop.f32.mrb[73].mxu0  ;;  %v1143_v20 = vpop.f32.mrb[73].mxu1 }
 0x180   : > { %v792_v21 = vpop.f32.mrb[74].mxu0  ;;  %v1145_v22 = vpop.f32.mrb[74].mxu1  ;;  %v2412_v23 = vcombine.low %v2404_v17, %v2411_v18 }
 0x181   : > { %v794_v24 = vpop.f32.mrb[75].mxu0  ;;  %v1147_v25 = vpop.f32.mrb[75].mxu1 }
 0x182   : > { %v2419_v27 = vrot.slane %v2412_v23, %v2403_v12 }
 0x184   : > { %v2421_v39 = vadd.f32 %v2419_v27, %v2115_v26 }
 0x186   : > { %v798_v32 = vpop.f32.mrb[76].mxu0  ;;  %v1151_v28 = vpop.f32.mrb[76].mxu1  ;;  %2426 = vst.msk [vmem:[#allocation2] sm:$0xf] %vm3092_vm1, %v2421_v39 }
 0x187   : > { %v800_v40 = vpop.f32.mrb[77].mxu0  ;;  %v1153_v29 = vpop.f32.mrb[77].mxu1 }
 0x188   : > { %v802_v30 = vpop.f32.mrb[78].mxu0  ;;  %v1155_v33 = vpop.f32.mrb[78].mxu1 }
 0x189   : > { %v804_v34 = vpop.f32.mrb[79].mxu0  ;;  %v1157_v35 = vpop.f32.mrb[79].mxu1 }
 0x18d   : > { %v2430_v41 = vld [vmem:[#allocation2] sm:$0xf] }
 0x18e   : > { %v808_v36 = vpop.f32.mrb[80].mxu0  ;;  %v1161_v42 = vpop.f32.mrb[80].mxu1  ;;  %v2431_v37 = vmul.f32 0.00390625, %v2430_v41 }
 0x18f   : > { %v810_v38 = vpop.f32.mrb[81].mxu0  ;;  %v1163_v43 = vpop.f32.mrb[81].mxu1 }
 0x190   : > { %v812_v44 = vpop.f32.mrb[82].mxu0  ;;  %v1165_v45 = vpop.f32.mrb[82].mxu1  ;;  %2432 = vst.msk [vmem:[%s186_s27] sm:$0xf] %vm3092_vm1, %v2431_v37 }
 0x191   : > { %v814_v47 = vpop.f32.mrb[83].mxu0  ;;  %v1167_v48 = vpop.f32.mrb[83].mxu1 }
 0x192   : > { %2745 = shalt.err (!%p2742_p5)
}
 0x193   : > { %s2746_s9 = scalar_lea.hbm %s3231_s4, 64  ;;  %s2750_s18 = scalar_lea.hbm %s3283_s3, 128 }
 0x194   : > { %p2747_p6 = scmp.ne.s32.totalorder %s3231_s4, %s2746_s9  ;;  %p2751_p10 = scmp.lt.u32.totalorder %s3231_s4, %s3283_s3 }
 0x195   : > { %p2752_p11 = scmp.lt.u32.totalorder %s2750_s18, %s2746_s9  ;;  %p2754_p13 = scmp.lt.u32.totalorder %s2746_s9, %s3231_s4 }
 0x196   : > { %p2748_p7 = pnand %p2747_p6, %p2876_p4 }
 0x197   : > { %p2753_p12 = por %p2752_p11, %p2751_p10 }
 0x198   : > { %p2749_p9 = pneg %p2748_p7 }
 0x199   : > { %p2755_p0 = por %p2754_p13, %p2753_p12 }
 0x19b   : > { %p2756_p1 = pnand %p2755_p0, %p2749_p9 }
 0x19d   : > { %2759 = shalt.err (!%p2756_p1)
}
 0x19e   : > { %2636 = dma.vmem_to_hbm [thread:$0]  (%p2876_p4), %s3233_s28, 64, %s3231_s4, %s2434_s15   ;;  %v818_v46 = vpop.f32.mrb[84].mxu0  ;;  %v1171_v49 = vpop.f32.mrb[84].mxu1 }
 0x19f   : > { %v820_v50 = vpop.f32.mrb[85].mxu0  ;;  %v1173_v51 = vpop.f32.mrb[85].mxu1 }
 0x1a0   : > { %v822_v52 = vpop.f32.mrb[86].mxu0  ;;  %v1175_v53 = vpop.f32.mrb[86].mxu1 }
 0x1a1   : > { %v824_v54 = vpop.f32.mrb[87].mxu0  ;;  %v1177_v55 = vpop.f32.mrb[87].mxu1 }
 0x1a2   : > { %v828_v56 = vpop.f32.mrb[88].mxu0  ;;  %v1181_v31 = vpop.f32.mrb[88].mxu1 }
 0x1a3   : > { %v830_v57 = vpop.f32.mrb[89].mxu0  ;;  %v1183_v58 = vpop.f32.mrb[89].mxu1 }
 0x1a4   : > { %v832_v59 = vpop.f32.mrb[90].mxu0  ;;  %v1185_v60 = vpop.f32.mrb[90].mxu1 }
 0x1a5   : > { %v834_v61 = vpop.f32.mrb[91].mxu0  ;;  %v1187_v62 = vpop.f32.mrb[91].mxu1 }
 0x1a6   : > { %v838_v63 = vpop.f32.mrb[92].mxu0  ;;  %v1191_v0 = vpop.f32.mrb[92].mxu1 }
 0x1a7   : > { %v840_v1 = vpop.f32.mrb[93].mxu0  ;;  %v1193_v3 = vpop.f32.mrb[93].mxu1 }
 0x1a8   : > { %v842_v4 = vpop.f32.mrb[94].mxu0  ;;  %v1195_v5 = vpop.f32.mrb[94].mxu1 }
 0x1a9   : > { %v844_v2 = vpop.f32.mrb[95].mxu0  ;;  %v1197_v6 = vpop.f32.mrb[95].mxu1 }
 0x1ae   : > { %v848_v7 = vpop.f32.mrb[96].mxu0  ;;  %v1201_v8 = vpop.f32.mrb[96].mxu1 }
 0x1af   : > { %v850_v9 = vpop.f32.mrb[97].mxu0  ;;  %v1203_v10 = vpop.f32.mrb[97].mxu1 }
 0x1b0   : > { %v852_v11 = vpop.f32.mrb[98].mxu0  ;;  %v1205_v12 = vpop.f32.mrb[98].mxu1 }
 0x1b1   : > { %v854_v13 = vpop.f32.mrb[99].mxu0  ;;  %v1207_v14 = vpop.f32.mrb[99].mxu1 }
 0x1b6   : > { %v858_v15 = vpop.f32.mrb[100].mxu0  ;;  %v1211_v16 = vpop.f32.mrb[100].mxu1 }
 0x1b7   : > { %v860_v17 = vpop.f32.mrb[101].mxu0  ;;  %v1213_v18 = vpop.f32.mrb[101].mxu1 }
 0x1b8   : > { %v862_v19 = vpop.f32.mrb[102].mxu0  ;;  %v1215_v20 = vpop.f32.mrb[102].mxu1 }
 0x1b9   : > { %v864_v21 = vpop.f32.mrb[103].mxu0  ;;  %v1217_v22 = vpop.f32.mrb[103].mxu1 }
 0x1be   : > { %v868_v23 = vpop.f32.mrb[104].mxu0  ;;  %v1221_v24 = vpop.f32.mrb[104].mxu1 }
 0x1bf   : > { %v870_v25 = vpop.f32.mrb[105].mxu0  ;;  %v1223_v26 = vpop.f32.mrb[105].mxu1 }
 0x1c0   : > { %v872_v27 = vpop.f32.mrb[106].mxu0  ;;  %v1225_v39 = vpop.f32.mrb[106].mxu1 }
 0x1c1   : > { %v874_v32 = vpop.f32.mrb[107].mxu0  ;;  %v1227_v28 = vpop.f32.mrb[107].mxu1 }
 0x1c6   : > { %v878_v40 = vpop.f32.mrb[108].mxu0  ;;  %v1231_v29 = vpop.f32.mrb[108].mxu1 }
 0x1c7   : > { %v880_v30 = vpop.f32.mrb[109].mxu0  ;;  %v1233_v33 = vpop.f32.mrb[109].mxu1 }
 0x1c8   : > { %v882_v34 = vpop.f32.mrb[110].mxu0  ;;  %v1235_v35 = vpop.f32.mrb[110].mxu1 }
 0x1c9   : > { %v884_v41 = vpop.f32.mrb[111].mxu0  ;;  %v1237_v36 = vpop.f32.mrb[111].mxu1 }
 0x1ce   : > { %v888_v42 = vpop.f32.mrb[112].mxu0  ;;  %v1241_v37 = vpop.f32.mrb[112].mxu1 }
 0x1cf   : > { %v890_v38 = vpop.f32.mrb[113].mxu0  ;;  %v1243_v43 = vpop.f32.mrb[113].mxu1 }
 0x1d0   : > { %v892_v44 = vpop.f32.mrb[114].mxu0  ;;  %v1245_v45 = vpop.f32.mrb[114].mxu1 }
 0x1d1   : > { %v894_v47 = vpop.f32.mrb[115].mxu0  ;;  %v1247_v48 = vpop.f32.mrb[115].mxu1 }
 0x1d6   : > { %v898_v46 = vpop.f32.mrb[116].mxu0  ;;  %v1251_v49 = vpop.f32.mrb[116].mxu1 }
 0x1d7   : > { %v900_v50 = vpop.f32.mrb[117].mxu0  ;;  %v1253_v51 = vpop.f32.mrb[117].mxu1 }
 0x1d8   : > { %v902_v52 = vpop.f32.mrb[118].mxu0  ;;  %v1255_v53 = vpop.f32.mrb[118].mxu1 }
 0x1d9   : > { %v904_v54 = vpop.f32.mrb[119].mxu0  ;;  %v1257_v55 = vpop.f32.mrb[119].mxu1 }
 0x1de   : > { %v908_v56 = vpop.f32.mrb[120].mxu0  ;;  %v1261_v31 = vpop.f32.mrb[120].mxu1 }
 0x1df   : > { %v910_v57 = vpop.f32.mrb[121].mxu0  ;;  %v1263_v58 = vpop.f32.mrb[121].mxu1 }
 0x1e0   : > { %v912_v59 = vpop.f32.mrb[122].mxu0  ;;  %v1265_v60 = vpop.f32.mrb[122].mxu1 }
 0x1e1   : > { %v914_v61 = vpop.f32.mrb[123].mxu0  ;;  %v1267_v62 = vpop.f32.mrb[123].mxu1 }
 0x1e6   : > { %v918_v63 = vpop.f32.mrb[124].mxu0  ;;  %v1271_v0 = vpop.f32.mrb[124].mxu1 }
 0x1e7   : > { %v920_v1 = vpop.f32.mrb[125].mxu0  ;;  %v1273_v3 = vpop.f32.mrb[125].mxu1 }
 0x1e8   : > { %v922_v4 = vpop.f32.mrb[126].mxu0  ;;  %v1275_v5 = vpop.f32.mrb[126].mxu1 }
 0x1e9   : > { %v924_v2 = vpop.f32.mrb[127].mxu0  ;;  %v1277_v6 = vpop.f32.mrb[127].mxu1 }
 0x1ea PF: > { %p2642_p4 = scmp.ge.s32.totalorder %s2810_s17, 2  ;;  %s2460_s22 = sand.u32 1, %s2790_s12  }
 0x1eb   : > { %s2461_s23 = scalar_lea.sflag [#allocation4], %s2460_s22 }
 0x1ec   : > { %p2639_p2 = pnand %p2642_p4, %p2883_p8 }
 0x1ee   : > { %2785 = dma.done.wait (!%p2639_p2), %s2461_s23, 64  }
 0x1ef   : > { %2787 = vsyncadd (!%p2639_p2), %s2461_s23, 4294967232  ;;  %s16_s17 = sadd.s32 1, %s2810_s17   ;;  %s3288_s12 = smov %s2794_s13 }
 0x1f0   : > { %p13_p3 = scmp.ge.s32.totalorder %s16_s17, 4   ;;  %s3289_s13 = smov %s2798_s14 }
 0x1f1   : > { %s3290_s14 = smov %s2889_s25  ;;  %s3291_s15 = smov %s2806_s16 }
 0x1f2   : > { %s3292_s16 = smov %s3294_s20  ;;  %15 = sbr.rel (!%p13_p3) target bundleno = 4 (0x4), region = 75 }
 0x1f9   :  { %2466 = vsyncpa [#allocation4], 1 }
 0x1fa   :  { %2468 = vsyncpa [#allocation4 + $0x1], 1 }

</bundles_post_ra>
